<compile_context>
chip_gen: v6e
topology: v6e:2x2x1
jax: 0.10.0
libtpu: 0.0.40
codegen_flags: <defaults>
</compile_context>

<pallas_src>
import functools

import jax
import jax.numpy as jnp
from jax.experimental import pallas as pl
from jax.experimental.pallas import tpu as pltpu


def _round_up(a, b):
    return (a + b - 1) // b * b


def _vmem_budget_bytes():
    """~80% of this chip's per-core VMEM (v5e/v6e: 128 MiB, v7x: 64 MiB)."""
    try:
        cap = int(pltpu.get_tpu_info().vmem_capacity_bytes)
    except Exception:
        cap = 64 << 20              # conservative fallback == v7x per-core VMEM
    return int(cap * 0.8)


def _choose_tm(n_rows, hidden, itemsize, vmem_budget):
    """Largest MXU-row-aligned row tile that fits VMEM, keeping >=2 grid steps."""
    if n_rows <= 256:
        return n_rows               # one block == full array dim (always legal)
    # tm-independent VMEM: resident single-buffered bf16 weight + bias + slack.
    fixed = hidden * hidden * 2 + 4 * hidden * 4 + (2 << 20)
    # Per-row VMEM: double-buffered x/out tiles + ~3 f32 (tm, H) intermediates.
    per_row = 2 * 2 * hidden * itemsize + 3 * hidden * 4
    tm_fit = max(256, (vmem_budget - fixed) // per_row)
    tm = min(int(tm_fit), 2048, _round_up(n_rows, 256))
    tm = max(256, (tm // 256) * 256)
    # Keep >= 2 grid steps so both v7x TensorCores get work
    # (dimension_semantics=("parallel",) shards the row axis across cores).
    if pl.cdiv(n_rows, tm) < 2:
        tm = max(256, _round_up(pl.cdiv(n_rows, 2), 256))
    return tm


def _sublayer_connection_kernel(x_ref, w_ref, b_ref, o_ref, *,
                                eps, hidden, p, training, seed):
    # ---- LayerNorm (matches torch: unbiased std, eps added to the std) ----
    x = x_ref[...].astype(jnp.float32)                          # (tm, H)
    mean = jnp.mean(x, axis=-1, keepdims=True)                  # (tm, 1)
    xc = x - mean
    var_unbiased = jnp.sum(xc * xc, axis=-1, keepdims=True) * (1.0 / (hidden - 1))
    # Per-row reciprocal on the EUP slot instead of a (tm, H) VALU divide.
    inv = pl.reciprocal(jnp.sqrt(var_unbiased) + eps, approx=True)   # (tm, 1)
    normed = xc * inv            # gamma/beta are folded into w_ref / b_ref

    # ---- sublayer: Linear(H, H) on the MXU; bf16 operands, f32 accumulation ----
    s = jnp.dot(normed.astype(jnp.bfloat16), w_ref[...],
                preferred_element_type=jnp.float32)
    s = s + b_ref[...].astype(jnp.float32)                      # (tm, H)

    # ---- dropout (train mode only; eval is identity, like nn.Dropout) ----
    if training and p > 0.0:
        pltpu.prng_seed(seed + pl.program_id(0))
        bits = pltpu.bitcast(pltpu.prng_random_bits(s.shape), jnp.uint32)
        thresh = jnp.uint32(min(int(p * 4294967296.0), 0xFFFFFFFF))
        scale = jnp.float32(1.0 / (1.0 - p))
        s = jnp.where(bits >= thresh, s * scale, 0.0)

    # ---- residual: re-read x in its native dtype so the f32 copy above is not
    # kept live across the matmul (smaller VMEM/vreg footprint). ----
    o_ref[...] = (x_ref[...].astype(jnp.float32) + s).astype(o_ref.dtype)


def fold_sublayer_params(gamma, beta, w, w_bias):
    """Fold LayerNorm affine into the Linear: W' = diag(gamma)@W (bf16),
    b' = beta@W + bias (f32).  Call ONCE per parameter update, outside the
    per-step hot path, so the f32->bf16 weight cast doesn't hit HBM every call.

    NOTE: torch nn.Linear stores weight as (out, in) and computes x @ W^T;
    pass W already transposed to (in, out) here.
    """
    h = w.shape[0]
    gamma = gamma.reshape(h).astype(jnp.float32)
    beta = beta.reshape(1, h).astype(jnp.float32)
    w32 = w.astype(jnp.float32)
    w_fused = (gamma[:, None] * w32).astype(jnp.bfloat16)
    b_fused = beta @ w32 + w_bias.reshape(1, h).astype(jnp.float32)
    return w_fused, b_fused


def sublayer_connection(x, w_fused, b_fused, *, eps=1e-6, p=0.1,
                        training=False, seed=0, tm=None):
    """x: (..., H) in f32 or bf16 (output matches x.dtype);
    w_fused: (H, H) bf16; b_fused: (1, H) f32 — from fold_sublayer_params."""
    orig_shape = x.shape
    H = orig_shape[-1]
    x2d = x.reshape(-1, H)
    N = x2d.shape[0]
    itemsize = x2d.dtype.itemsize

    budget = _vmem_budget_bytes()
    if tm is None:
        tm = _choose_tm(N, H, itemsize, budget)
    # No jnp.pad: a partial last block over-reads; tail rows are never written
    # back and every row's math is independent, so garbage cannot propagate.
    grid = (pl.cdiv(N, tm),)

    needed = (2 * 2 * tm * H * itemsize        # x + out tiles, double-buffered
              + H * H * 2                      # bf16 weight, single-buffered
              + 2 * 2 * H * 4                  # fused bias (tiny)
              + 4 * tm * H * 4                 # f32 intermediates slack
              + (2 << 20))
    vmem_limit = int(min(max(needed, 4 << 20), budget))

    cost = pl.CostEstimate(
        flops=2 * grid[0] * tm * H * H,
        transcendentals=2 * N,
        bytes_accessed=2 * N * H * itemsize + H * H * 2 + H * 4)

    kernel = functools.partial(
        _sublayer_connection_kernel,
        eps=eps, hidden=H, p=p, training=training, seed=seed)

    out = pl.pallas_call(
        kernel,
        out_shape=jax.ShapeDtypeStruct((N, H), x2d.dtype),
        grid=grid,
        in_specs=[
            pl.BlockSpec((tm, H), lambda i: (i, 0)),            # x row tile
            pl.BlockSpec((H, H), lambda i: (0, 0),
                         pipeline_mode=pl.Buffered(1)),         # resident W'
            pl.BlockSpec((1, H), lambda i: (0, 0)),             # fused bias
        ],
        out_specs=pl.BlockSpec((tm, H), lambda i: (i, 0)),
        compiler_params=pltpu.CompilerParams(
            dimension_semantics=("parallel",),
            vmem_limit_bytes=vmem_limit),
        cost_estimate=cost,
    )(x2d, w_fused, b_fused)

    # TODO(synk): for transformer-scale H (>= ~4096) on v7x the single resident
    # (H,H) bf16 weight no longer fits 64 MiB VMEM; add a second grid axis over
    # weight output columns with the normed row tile cached in VMEM scratch.
    # TODO(synk): callers must vary `seed` per training step / layer, otherwise
    # dropout masks repeat per row-tile position.
    return out.reshape(orig_shape)


def _reference_eval(x, gamma, beta, w, w_bias, eps=1e-6):
    # Pure-JAX reference of the eval-mode forward (dropout == identity).
    mean = jnp.mean(x, axis=-1, keepdims=True)
    xc = x - mean
    std = jnp.sqrt(jnp.sum(xc * xc, axis=-1, keepdims=True) / (x.shape[-1] - 1))
    normed = gamma * xc / (std + eps) + beta
    return x + (normed @ w + w_bias)


if __name__ == "__main__":
    batch, seq, hidden = 2, 256, 128   # N = 512 rows -> 2 grid steps (both v7x TCs)

    key = jax.random.PRNGKey(0)
    kx, kw = jax.random.split(key)

    x = jax.random.normal(kx, (batch, seq, hidden), dtype=jnp.float32)

    # Module parameters (shapes from the torch __init__): LayerNorm a_2 / b_2,
    # Linear(size, size) weight (already transposed to (in, out)) and bias.
    gamma = jnp.ones((hidden,), dtype=jnp.float32)
    beta = jnp.zeros((hidden,), dtype=jnp.float32)
    w = jax.random.normal(kw, (hidden, hidden), dtype=jnp.float32) * 0.02
    w_bias = jnp.zeros((hidden,), dtype=jnp.float32)

    # Fold LayerNorm affine into the Linear once, outside the per-call path.
    w_fused, b_fused = fold_sublayer_params(gamma, beta, w, w_bias)

    # Eval-mode run (dropout is identity) so the result is deterministic.
    out = sublayer_connection(x, w_fused, b_fused, p=0.1, training=False)
    out = jax.block_until_ready(out)

    ref = _reference_eval(x.reshape(-1, hidden), gamma, beta, w,
                          w_bias.reshape(1, hidden)).reshape(batch, seq, hidden)
    assert out.shape == (batch, seq, hidden)
    # Tolerance covers bf16 MXU operands + approx EUP reciprocal (f32 accumulation).
    assert jnp.allclose(out, ref, atol=2e-2, rtol=2e-2), "mismatch vs reference"

    print("KERNEL_OK")
</pallas_src>

<mosaic_0001>
module attributes {stable_mosaic.version = 11 : i64} {
  func.func @_sublayer_connection_kernel(%arg0: i32, %arg1: memref<256x128xf32, #tpu.memory_space<vmem>>, %arg2: memref<128x128xbf16, #tpu.memory_space<vmem>>, %arg3: memref<1x128xf32, #tpu.memory_space<vmem>>, %arg4: memref<256x128xf32, #tpu.memory_space<vmem>>) attributes {dimension_semantics = [#tpu.dimension_semantics<parallel>], iteration_bounds = array<i64: 2>, scalar_prefetch = 0 : i64, scratch_operands = 0 : i64, tpu.core_type = #tpu.core_type<tc>, window_params = [{transform_indices = @transform_0, window_bounds = array<i64: 256, 128>}, {pipeline_mode = #tpu.pipeline_mode<synchronous>, transform_indices = @transform_1, window_bounds = array<i64: 128, 128>}, {pipeline_mode = #tpu.pipeline_mode<synchronous>, transform_indices = @transform_2, window_bounds = array<i64: 1, 128>}, {transform_indices = @transform_3, window_bounds = array<i64: 256, 128>}]} {
    %c0 = arith.constant 0 : index
    %c0_0 = arith.constant 0 : index
    %0 = vector.load %arg1[%c0, %c0_0] : memref<256x128xf32, #tpu.memory_space<vmem>>, vector<256x128xf32>
    %cst = arith.constant dense<0.000000e+00> : vector<256xf32>
    %1 = vector.multi_reduction <add>, %0, %cst [1] : vector<256x128xf32> to vector<256xf32>
    %2 = vector.shape_cast %1 : vector<256xf32> to vector<256x1xf32>
    %cst_1 = arith.constant 1.280000e+02 : f32
    %3 = vector.broadcast %cst_1 : f32 to vector<256x1xf32>
    %4 = arith.divf %2, %3 : vector<256x1xf32>
    %5 = vector.broadcast %4 : vector<256x1xf32> to vector<256x128xf32>
    %6 = arith.subf %0, %5 : vector<256x128xf32>
    %7 = arith.mulf %6, %6 : vector<256x128xf32>
    %cst_2 = arith.constant dense<0.000000e+00> : vector<256xf32>
    %8 = vector.multi_reduction <add>, %7, %cst_2 [1] : vector<256x128xf32> to vector<256xf32>
    %9 = vector.shape_cast %8 : vector<256xf32> to vector<256x1xf32>
    %cst_3 = arith.constant 0.00787401571 : f32
    %10 = vector.broadcast %cst_3 : f32 to vector<256x1xf32>
    %11 = arith.mulf %9, %10 : vector<256x1xf32>
    %12 = math.sqrt %11 : vector<256x1xf32>
    %cst_4 = arith.constant 9.99999997E-7 : f32
    %13 = vector.broadcast %cst_4 : f32 to vector<256x1xf32>
    %14 = arith.addf %12, %13 : vector<256x1xf32>
    %15 = tpu.reciprocal %14 {approx = true} : vector<256x1xf32> -> vector<256x1xf32>
    %16 = vector.broadcast %15 : vector<256x1xf32> to vector<256x128xf32>
    %17 = arith.mulf %6, %16 : vector<256x128xf32>
    %18 = arith.truncf %17 : vector<256x128xf32> to vector<256x128xbf16>
    %c0_5 = arith.constant 0 : index
    %c0_6 = arith.constant 0 : index
    %19 = vector.load %arg2[%c0_5, %c0_6] : memref<128x128xbf16, #tpu.memory_space<vmem>>, vector<128x128xbf16>
    %cst_7 = arith.constant dense<0.000000e+00> : vector<256x128xf32>
    %20 = tpu.matmul %18, %19, %cst_7 {dimension_numbers = #tpu.dot_dimension_numbers<[1], [0], [0], [1], [0, 0, 1, 1], [], []>} : vector<256x128xbf16>, vector<128x128xbf16>, vector<256x128xf32> -> vector<256x128xf32>
    %c0_8 = arith.constant 0 : index
    %c0_9 = arith.constant 0 : index
    %21 = vector.load %arg3[%c0_8, %c0_9] : memref<1x128xf32, #tpu.memory_space<vmem>>, vector<1x128xf32>
    %22 = vector.broadcast %21 : vector<1x128xf32> to vector<256x128xf32>
    %23 = arith.addf %20, %22 : vector<256x128xf32>
    %c0_10 = arith.constant 0 : index
    %c0_11 = arith.constant 0 : index
    %24 = vector.load %arg1[%c0_10, %c0_11] : memref<256x128xf32, #tpu.memory_space<vmem>>, vector<256x128xf32>
    %25 = arith.addf %24, %23 : vector<256x128xf32>
    %c0_12 = arith.constant 0 : index
    %c0_13 = arith.constant 0 : index
    %26 = vector.load %arg4[%c0_12, %c0_13] : memref<256x128xf32, #tpu.memory_space<vmem>>, vector<256x128xf32>
    tpu.vector_store %arg4[%c0_12, %c0_13], %25 {strides = array<i32>} : memref<256x128xf32, #tpu.memory_space<vmem>>, vector<256x128xf32>,
    return
  }
  func.func @transform_0(%arg0: i32) -> (i32, i32) {
    %c0_i32 = arith.constant 0 : i32
    %c0_i32_0 = arith.constant 0 : i32
    return %arg0, %c0_i32 : i32, i32
  }
  func.func @transform_1(%arg0: i32) -> (i32, i32) {
    %c0_i32 = arith.constant 0 : i32
    %c0_i32_0 = arith.constant 0 : i32
    %c0_i32_1 = arith.constant 0 : i32
    return %c0_i32, %c0_i32_0 : i32, i32
  }
  func.func @transform_2(%arg0: i32) -> (i32, i32) {
    %c0_i32 = arith.constant 0 : i32
    %c0_i32_0 = arith.constant 0 : i32
    %c0_i32_1 = arith.constant 0 : i32
    return %c0_i32, %c0_i32_0 : i32, i32
  }
  func.func @transform_3(%arg0: i32) -> (i32, i32) {
    %c0_i32 = arith.constant 0 : i32
    %c0_i32_0 = arith.constant 0 : i32
    return %arg0, %c0_i32 : i32, i32
  }
}

</mosaic_0001>

<bundles_post_ra>
// kernel: tpu_custom_call.1
= control target key start
LH: loop header
LB: loop body
LE: loop exit
PB: predicated region body
PF: predicated region fallthrough
CT: control target
= control target key end

     0   :  { %8 = vsyncpa [#allocation3], 0  ;;  %s2807_s0 = inlined_call_operand.hbm [shape: f32[512,128], index: 0, kind: input, shape index: {}]   ;;  %s2808_s1 = inlined_call_operand.hbm [shape: bf16[128,128], index: 1, kind: input, shape index: {}]   ;;  %s2809_s2 = inlined_call_operand.vmem [shape: f32[1,128], index: 2, kind: input, shape index: {}]   ;;  %s2810_s3 = inlined_call_operand.hbm [shape: f32[512,128], index: 3, kind: output, shape index: {}]  }
   0x1   :  { %10 = vsyncpa [#allocation3 + $0x1], 0 }
   0x2   :  { %11 = vsyncpa [#allocation6], 0 }
   0x3   :  { %12 = vsyncpa [#allocation4], 0 }
   0x4   :  { %14 = vsyncpa [#allocation4 + $0x1], 0  ;;  %s1724_s12 = smov 0   ;;  %s1726_s13 = smov 0  }
   0x5   :  { %s1728_s14 = smov 0   ;;  %s1730_s15 = smov 0  }
   0x6 LB: > { %s1745_s16 = sadd.s32 4294967295, %s1693_s15   ;;  %s1225_s17 = sadd.s32 4294967294, %s1693_s15   ;;  %s1693_s15 = sphi %s1730_s15, %s2908_s15   ;;  %s1689_s14 = sphi %s1728_s14, %s2907_s14   ;;  %s1685_s13 = sphi %s1726_s13, %s2906_s13   ;;  %s1681_s12 = sphi %s1724_s12, %s2905_s12  }
   0x7   : > { %p40_p0 = scmp.ne.s32.totalorder %s1685_s13, %s1681_s12  ;;  %p2811_p1 = scmp.eq.s32.totalorder %s1745_s16, 0 }
   0x8   : > { %p112_p3 = scmp.eq.s32.totalorder %s1225_s17, 1  ;;  %p1226_p5 = scmp.ge.s32.totalorder %s1693_s15, 1 }
   0x9   : > { %p1754_p4 = por %p2811_p1, %p40_p0  ;;  %p119_p7 = scmp.lt.s32.totalorder %s1693_s15, 3 }
   0xa   : > { %p1759_p6 = por %p112_p3, %p40_p0  ;;  %s1695_s21 = smov [#allocation5]  }
   0xb   : > { %s2832_s18 = scalar_select %p1754_p4, 1, 0 }
   0xc   : > { %s2833_s19 = scalar_select %p1759_p6, 1, 0 }
   0xd   : > { %p1764_p8 = pnand %p1226_p5, %p119_p7  ;;  %s131_s22 = sshll.u32 %s1695_s21, 4  ;;  %s132_s22 = int_to_ptr.vmem [resolvable:$true] %s131_s22 }
   0xe   : > { %s1778_s24 = sadd.s32 1, %s1693_s15   ;;  %s27_s25 = sadd.s32 1, %s1689_s14 }
   0xf   : > { %s2834_s20 = scalar_select %p1764_p8, 1, 0 }
  0x10   : > { %p1348_p9 = pneg %p1764_p8  ;;  %s24_s26 = ssub.s32 %s1693_s15, %s1778_s24 }
  0x11   : > { %s1582_s27 = scalar_lea.vmem %s132_s22, 1024  ;;  %p1590_p5 = scmp.lt.s32.totalorder %s132_s22, %s132_s22 }
  0x12   : > { %p1773_p11 = pnand %p1348_p9, %p2811_p1  ;;  %p1583_p13 = scmp.ne.s32.totalorder %s132_s22, %s1582_s27 }
  0x13   : > { %p1591_p7 = scmp.lt.s32.totalorder %s1582_s27, %s1582_s27 }
  0x14   : > { %p1573_p12 = pneg %p1773_p11 }
  0x15   : > { %p1592_p10 = por %p1591_p7, %p1590_p5 }
  0x16   : > { %p1585_p0 = pnand %p1583_p13, %p1573_p12 }
  0x18   : > { %p1586_p3 = pneg %p1585_p0 }
  0x1a   : > { %p1593_p2 = pnand %p1592_p10, %p1586_p3 }
  0x1c   : > { %1596 = shalt.err (!%p1593_p2)
}
  0x1d   : > { %s1696_s28 = smov 64   ;;  %s1697_s29 = smov 4  }
  0x1e   : > { %1351 = dma.hbm_to_vmem [thread:$0]  (!%p1773_p11), %s2808_s1, 1024, %s132_s22, [#allocation6], %s1696_s28, %s1696_s28, %s1697_s29  }
  0x1f   : > { %p25_p9 = scmp.eq.s32.totalorder %s24_s26, 0  ;;  %p34_p12 = scmp.ne.s32.totalorder %s1689_s14, %s1685_s13 }
  0x20   : > { %p35_p10 = scmp.eq.s32.totalorder %s1693_s15, 0  ;;  %p1361_p2 = scmp.lt.s32.totalorder %s1693_s15, 2 }
  0x21   : > { %s1795_s5 = scalar_select %p25_p9, %s1689_s14, %s27_s25  }
  0x22   : > { %p36_p13 = por %p35_p10, %p34_p12  ;;  %p2836_p0 = scmp.eq.s32.totalorder %s1745_s16, 1 }
  0x23   : > { %s148_s7 = sand.u32 1, %s1689_s14   ;;  %s1250_s8 = sshll.u32 %s1693_s15, 12 }
  0x24   : > { %p1799_p3 = por %p2836_p0, %p34_p12  ;;  %s1229_s9 = sshll.u32 %s148_s7, 8 }
  0x25   : > { %s1808_s17 = scalar_lea.hbm %s2807_s0, %s1250_s8  ;;  %s152_s21 = scalar_lea.vmem [#allocation2], %s1229_s9 }
  0x26   : > { %s2837_s6 = scalar_select %p1799_p3, 1, 0 }
  0x27   : > { %s159_s22 = sshll.u32 %s152_s21, 4  ;;  %p1810_p11 = pnand %p1361_p2, %p36_p13  ;;  %s1814_s22 = int_to_ptr.vmem [resolvable:$true] %s159_s22 }
  0x28   : > { %s1816_s25 = scalar_lea.sflag [#allocation3], %s148_s7  ;;  %s1597_s26 = scalar_lea.hbm %s1808_s17, 4096 }
  0x29   : > { %p1598_p5 = scmp.ne.s32.totalorder %s1808_s17, %s1597_s26  ;;  %p1599_p7 = pneg %p1810_p11 }
  0x2a   : > { %s1602_s29 = scalar_lea.hbm %s2807_s0, 8192  ;;  %p1603_p10 = scmp.lt.s32.totalorder %s1808_s17, %s2807_s0 }
  0x2b   : > { %p1600_p9 = pnand %p1599_p7, %p1598_p5  ;;  %p1604_p2 = scmp.lt.s32.totalorder %s1602_s29, %s1597_s26 }
  0x2d   : > { %p1601_p12 = pneg %p1600_p9  ;;  %p1605_p13 = por %p1604_p2, %p1603_p10 }
  0x2f   : > { %p1606_p0 = pnand %p1605_p13, %p1601_p12 }
  0x31   : > { %1609 = shalt.err (!%p1606_p0)
}
  0x32   : > { %s1610_s7 = scalar_lea.vmem %s1814_s22, 4096  ;;  %s1698_s8 = smov [#allocation2]  }
  0x33   : > { %p1611_p1 = scmp.ne.s32.totalorder %s1814_s22, %s1610_s7  ;;  %s1615_s9 = sshll.u32 %s1698_s8, 4  ;;  %s1616_s9 = int_to_ptr.vmem [resolvable:$false] %s1615_s9 }
  0x34   : > { %s1617_s10 = scalar_lea.vmem %s1616_s9, 8192  ;;  %p1618_p9 = scmp.lt.s32.totalorder %s1814_s22, %s1616_s9 }
  0x35   : > { %p1613_p6 = pnand %p1611_p1, %p1599_p7  ;;  %p1619_p3 = scmp.lt.s32.totalorder %s1617_s10, %s1610_s7 }
  0x37   : > { %p1614_p5 = pneg %p1613_p6  ;;  %p1620_p4 = por %p1619_p3, %p1618_p9 }
  0x39   : > { %p1621_p8 = pnand %p1620_p4, %p1614_p5 }
  0x3b   : > { %1624 = shalt.err (!%p1621_p8)
}
  0x3c   : > { %s1699_s11 = smov 128   ;;  %s1700_s21 = smov 8  }
  0x3d   : > { %1355 = dma.hbm_to_vmem [thread:$0]  (!%p1810_p11), %s1808_s17, 4096, %s1814_s22, %s1816_s25, %s1699_s11, %s1699_s11, %s1700_s21  }
  0x3e   : > { %p2839_p1 = scmp.ne.s32.totalorder %s2834_s20, 0 }
  0x40   : > { %171 = sbr.rel (%p2839_p1) target bundleno = 700 (0x2bc), region = 32 }
  0x45   : > { %s1840_s26 = sand.u32 1, %s1685_s13   ;;  %p2840_p4 = scmp.ne.s32.totalorder %s2832_s18, 0 }
  0x46   : > { %s1233_s27 = sshll.u32 %s1840_s26, 8  ;;  %s174_s28 = scalar_lea.sflag [#allocation3], %s1840_s26 }
  0x47   : > { %s1846_s29 = scalar_lea.vmem [#allocation2], %s1233_s27 }
  0x48   : > { %1668 = dma.done.wait (%p2840_p4), %s174_s28, 4096  }
  0x49   : > { %1670 = vsyncadd (%p2840_p4), %s174_s28, 4294963200  ;;  %p2841_p6 = scmp.eq.s32.totalorder %s1745_s16, 0 }
  0x4b   : > { %1672 = dma.done.wait (%p2841_p6), [#allocation6], 1024   ;;  %p2842_p8 = pmov %p2841_p6 }
  0x4c   : > { %v1857_v0 = vld [vmem:[%s1846_s29] sm:$0xff]  ;;  %v1865_v2 = vld [vmem:[%s1846_s29 + $0x8] sm:$0xff]  ;;  %v1873_v4 = vld [vmem:[%s1846_s29 + $0x10] sm:$0xff]  ;;  %s2662_s17 = scalar_lea.vmem [#allocation7], %s1233_s27  ;;  %s1251_s22 = sshll.u32 %s1745_s16, 12 }
  0x4d   : > { %1674 = vsyncadd (%p2842_p8), [#allocation6], 4294966272  ;;  %v1860_v1 = vld [vmem:[%s1846_s29 + $0x80] sm:$0xff]  ;;  %239 = vadd.xlane.f32.xlu0 %v1857_v0  ;;  %v1868_v3 = vld [vmem:[%s1846_s29 + $0x88] sm:$0xff]  ;;  %s1142_s23 = sshll.u32 %s2662_s17, 4  ;;  %s2758_s4 = scalar_lea.hbm %s2810_s3, %s1251_s22  ;;  %s2760_s23 = int_to_ptr.vmem [resolvable:$true] %s1142_s23 }
  0x4e   : > { %271 = vadd.xlane.f32.xlu1 %v1860_v1  ;;  %v1876_v5 = vld [vmem:[%s1846_s29 + $0x18] sm:$0xff]  ;;  %v1881_v6 = vld [vmem:[%s1846_s29 + $0x90] sm:$0xff]  ;;  %v1887_v8 = vld [vmem:[%s1846_s29 + $0x20] sm:$0xff]  ;;  %s1129_s16 = scalar_lea.sflag [#allocation4], %s1840_s26  ;;  %s1625_s7 = scalar_lea.vmem %s2760_s23, 4096 }
  0x4f   : > { %v1884_v7 = vld [vmem:[%s1846_s29 + $0x98] sm:$0xff]  ;;  %v1890_v9 = vld [vmem:[%s1846_s29 + $0x28] sm:$0xff]  ;;  %v1897_v10 = vld [vmem:[%s1846_s29 + $0xa0] sm:$0xff]  ;;  %p1626_p3 = scmp.ne.s32.totalorder %s2760_s23, %s1625_s7  ;;  %p2902_p11 = scmp.ne.s32.totalorder %s2837_s6, 0 }
  0x50   : > { %v1900_v11 = vld [vmem:[%s1846_s29 + $0xa8] sm:$0xff]  ;;  %v1905_v12 = vld [vmem:[%s1846_s29 + $0x30] sm:$0xff]  ;;  %v1908_v13 = vld [vmem:[%s1846_s29 + $0x38] sm:$0xff]  ;;  %s1701_s8 = smov [#allocation7]  }
  0x51   : > { %241 = vadd.xlane.f32.xlu0 %v1865_v2  ;;  %v1913_v14 = vld [vmem:[%s1846_s29 + $0xb0] sm:$0xff]  ;;  %v1916_v15 = vld [vmem:[%s1846_s29 + $0xb8] sm:$0xff]  ;;  %v1921_v16 = vld [vmem:[%s1846_s29 + $0x40] sm:$0xff]  ;;  %p1627_p7 = pnand %p1626_p3, %p2902_p11  ;;  %s1629_s9 = sshll.u32 %s1701_s8, 4  ;;  %s1630_s9 = int_to_ptr.vmem [resolvable:$false] %s1629_s9 }
  0x52   : > { %273 = vadd.xlane.f32.xlu1 %v1868_v3  ;;  %v1924_v17 = vld [vmem:[%s1846_s29 + $0x48] sm:$0xff]  ;;  %v1929_v18 = vld [vmem:[%s1846_s29 + $0xc0] sm:$0xff]  ;;  %v1937_v20 = vld [vmem:[%s1846_s29 + $0x50] sm:$0xff]  ;;  %s1631_s10 = scalar_lea.vmem %s1630_s9, 8192  ;;  %p1632_p10 = scmp.lt.s32.totalorder %s2760_s23, %s1630_s9 }
  0x53   : > { %v1932_v19 = vld [vmem:[%s1846_s29 + $0xc8] sm:$0xff]  ;;  %v1940_v21 = vld [vmem:[%s1846_s29 + $0x58] sm:$0xff]  ;;  %v1945_v22 = vld [vmem:[%s1846_s29 + $0xd0] sm:$0xff]  ;;  %p1628_p12 = pneg %p1627_p7  ;;  %p1633_p2 = scmp.lt.s32.totalorder %s1631_s10, %s1625_s7 }
  0x54   : > { %v1948_v23 = vld [vmem:[%s1846_s29 + $0xd8] sm:$0xff]  ;;  %v1953_v24 = vld [vmem:[%s1846_s29 + $0x60] sm:$0xff]  ;;  %v1956_v25 = vld [vmem:[%s1846_s29 + $0x68] sm:$0xff] }
  0x55   : > { %243 = vadd.xlane.f32.xlu0 %v1873_v4  ;;  %v1961_v26 = vld [vmem:[%s1846_s29 + $0xe0] sm:$0xff]  ;;  %v1964_v27 = vld [vmem:[%s1846_s29 + $0xe8] sm:$0xff]  ;;  %v1969_v28 = vld [vmem:[%s1846_s29 + $0x70] sm:$0xff]  ;;  %p1634_p13 = por %p1633_p2, %p1632_p10 }
  0x56   : > { %245 = vadd.xlane.f32.xlu1 %v1876_v5  ;;  %v1972_v29 = vld [vmem:[%s1846_s29 + $0x78] sm:$0xff]  ;;  %v1977_v30 = vld [vmem:[%s1846_s29 + $0xf0] sm:$0xff] }
  0x57   : > { %v1980_v31 = vld [vmem:[%s1846_s29 + $0xf8] sm:$0xff]  ;;  %p1635_p0 = pnand %p1634_p13, %p1628_p12 }
  0x59   : > { %275 = vadd.xlane.f32.xlu0 %v1881_v6 }
  0x5a   : > { %277 = vadd.xlane.f32.xlu1 %v1884_v7 }
  0x5d   : > { %247 = vadd.xlane.f32.xlu0 %v1887_v8 }
  0x5e   : > { %249 = vadd.xlane.f32.xlu1 %v1890_v9 }
  0x61   : > { %279 = vadd.xlane.f32.xlu0 %v1897_v10 }
  0x62   : > { %281 = vadd.xlane.f32.xlu1 %v1900_v11 }
  0x65   : > { %251 = vadd.xlane.f32.xlu0 %v1905_v12 }
  0x66   : > { %253 = vadd.xlane.f32.xlu1 %v1908_v13 }
  0x69   : > { %283 = vadd.xlane.f32.xlu0 %v1913_v14 }
  0x6a   : > { %285 = vadd.xlane.f32.xlu1 %v1916_v15 }
  0x6d   : > { %255 = vadd.xlane.f32.xlu0 %v1921_v16 }
  0x6e   : > { %257 = vadd.xlane.f32.xlu1 %v1924_v17 }
  0x71   : > { %287 = vadd.xlane.f32.xlu0 %v1929_v18 }
  0x72   : > { %289 = vadd.xlane.f32.xlu1 %v1932_v19 }
  0x75   : > { %259 = vadd.xlane.f32.xlu0 %v1937_v20 }
  0x76   : > { %261 = vadd.xlane.f32.xlu1 %v1940_v21 }
  0x79   : > { %291 = vadd.xlane.f32.xlu0 %v1945_v22 }
  0x7a   : > { %293 = vadd.xlane.f32.xlu1 %v1948_v23 }
  0x7d   : > { %263 = vadd.xlane.f32.xlu0 %v1953_v24 }
  0x7e   : > { %265 = vadd.xlane.f32.xlu1 %v1956_v25 }
  0x81   : > { %295 = vadd.xlane.f32.xlu0 %v1961_v26 }
  0x82   : > { %297 = vadd.xlane.f32.xlu1 %v1964_v27 }
  0x85   : > { %267 = vadd.xlane.f32.xlu0 %v1969_v28 }
  0x86   : > { %269 = vadd.xlane.f32.xlu1 %v1972_v29 }
  0x89   : > { %299 = vadd.xlane.f32.xlu0 %v1977_v30 }
  0x8a   : > { %301 = vadd.xlane.f32.xlu1 %v1980_v31 }
  0xd6   : > { %v240_v32 = vpop.xlane.xlu0 %239 }
  0xd7   : > { %v272_v33 = vpop.xlane.xlu1 %271  ;;  %v304_v34 = vmul.f32 0.0078125, %v240_v32 }
  0xd8   : > { %v320_v35 = vmul.f32 0.0078125, %v272_v33 }
  0xd9   : > { %v1985_v36 = vsub.f32 %v1857_v0, %v304_v34 }
  0xda   : > { %v1988_v37 = vsub.f32 %v1860_v1, %v320_v35  ;;  %v242_v38 = vpop.xlane.xlu0 %241 }
  0xdb   : > { %v274_v39 = vpop.xlane.xlu1 %273  ;;  %v305_v40 = vmul.f32 0.0078125, %v242_v38  ;;  %v368_v41 = vmul.f32 %v1985_v36, %v1985_v36 }
  0xdc   : > { %v321_v42 = vmul.f32 0.0078125, %v274_v39  ;;  %v384_v45 = vmul.f32 %v1988_v37, %v1988_v37 }
  0xdd   : > { %v1993_v43 = vsub.f32 %v1865_v2, %v305_v40  ;;  %400 = vadd.xlane.f32.xlu0 %v368_v41 }
  0xde   : > { %v1996_v44 = vsub.f32 %v1868_v3, %v321_v42  ;;  %v244_v46 = vpop.xlane.xlu0 %243 }
  0xdf   : > { %v246_v47 = vpop.xlane.xlu1 %245  ;;  %v306_v48 = vmul.f32 0.0078125, %v244_v46  ;;  %v369_v49 = vmul.f32 %v1993_v43, %v1993_v43 }
  0xe0   : > { %v307_v50 = vmul.f32 0.0078125, %v246_v47  ;;  %v385_v53 = vmul.f32 %v1996_v44, %v1996_v44 }
  0xe1   : > { %v2003_v51 = vsub.f32 %v1873_v4, %v306_v48  ;;  %432 = vadd.xlane.f32.xlu0 %v384_v45  ;;  %402 = vadd.xlane.f32.xlu1 %v369_v49 }
  0xe2   : > { %v2006_v52 = vsub.f32 %v1876_v5, %v307_v50  ;;  %v276_v54 = vpop.xlane.xlu0 %275 }
  0xe3   : > { %v278_v55 = vpop.xlane.xlu1 %277  ;;  %v322_v56 = vmul.f32 0.0078125, %v276_v54  ;;  %v370_v57 = vmul.f32 %v2003_v51, %v2003_v51 }
  0xe4   : > { %v323_v58 = vmul.f32 0.0078125, %v278_v55  ;;  %v371_v61 = vmul.f32 %v2006_v52, %v2006_v52 }
  0xe5   : > { %v2013_v59 = vsub.f32 %v1881_v6, %v322_v56  ;;  %434 = vadd.xlane.f32.xlu1 %v385_v53  ;;  %404 = vadd.xlane.f32.xlu0 %v370_v57 }
  0xe6   : > { %v2016_v60 = vsub.f32 %v1884_v7, %v323_v58  ;;  %v248_v62 = vpop.xlane.xlu0 %247 }
  0xe7   : > { %v250_v63 = vpop.xlane.xlu1 %249  ;;  %v308_v0 = vmul.f32 0.0078125, %v248_v62  ;;  %v386_v1 = vmul.f32 %v2013_v59, %v2013_v59 }
  0xe8   : > { %v309_v2 = vmul.f32 0.0078125, %v250_v63  ;;  %v387_v5 = vmul.f32 %v2016_v60, %v2016_v60 }
  0xe9   : > { %v2023_v3 = vsub.f32 %v1887_v8, %v308_v0  ;;  %406 = vadd.xlane.f32.xlu1 %v371_v61  ;;  %436 = vadd.xlane.f32.xlu0 %v386_v1  ;;  %v1403_v0 = vld [vmem:[#allocation5 + $0x38] sm:$0xff]  }
  0xea   : > { %v2026_v4 = vsub.f32 %v1890_v9, %v309_v2  ;;  %v280_v6 = vpop.xlane.xlu0 %279  ;;  %1276 = vmatprep.subr.bf16.mxu0 %v1403_v0  ;;  %1324 = vmatprep.subr.bf16.mxu1 %v1403_v0 }
  0xeb   : > { %v282_v7 = vpop.xlane.xlu1 %281  ;;  %v324_v32 = vmul.f32 0.0078125, %v280_v6  ;;  %v372_v33 = vmul.f32 %v2023_v3, %v2023_v3  ;;  %1277 = vmatpush3.bf16.msra.mxu0 %v1403_v0  ;;  %1332 = vmatpush3.bf16.msra.mxu1 %v1403_v0 }
  0xec   : > { %v325_v34 = vmul.f32 0.0078125, %v282_v7  ;;  %v373_v9 = vmul.f32 %v2026_v4, %v2026_v4 }
  0xed   : > { %v2033_v35 = vsub.f32 %v1897_v10, %v324_v32  ;;  %438 = vadd.xlane.f32.xlu1 %v387_v5  ;;  %408 = vadd.xlane.f32.xlu0 %v372_v33  ;;  %v1404_v33 = vld [vmem:[#allocation5 + $0x30] sm:$0xff]  }
  0xee   : > { %v2036_v8 = vsub.f32 %v1900_v11, %v325_v34  ;;  %v252_v38 = vpop.xlane.xlu0 %251  ;;  %1278 = vmatprep.subr.bf16.mxu0 %v1404_v33  ;;  %1325 = vmatprep.subr.bf16.mxu1 %v1404_v33 }
  0xef   : > { %v254_v39 = vpop.xlane.xlu1 %253  ;;  %v310_v40 = vmul.f32 0.0078125, %v252_v38  ;;  %v388_v41 = vmul.f32 %v2033_v35, %v2033_v35  ;;  %1279 = vmatpush3.bf16.msra.mxu0 %v1404_v33  ;;  %1333 = vmatpush3.bf16.msra.mxu1 %v1404_v33 }
  0xf0   : > { %v311_v42 = vmul.f32 0.0078125, %v254_v39  ;;  %v389_v11 = vmul.f32 %v2036_v8, %v2036_v8 }
  0xf1   : > { %v2043_v45 = vsub.f32 %v1905_v12, %v310_v40  ;;  %410 = vadd.xlane.f32.xlu1 %v373_v9  ;;  %440 = vadd.xlane.f32.xlu0 %v388_v41 }
  0xf2   : > { %v2046_v10 = vsub.f32 %v1908_v13, %v311_v42  ;;  %v284_v46 = vpop.xlane.xlu0 %283  ;;  %v1405_v42 = vld [vmem:[#allocation5 + $0x28] sm:$0xff]  }
  0xf3   : > { %v286_v47 = vpop.xlane.xlu1 %285  ;;  %v326_v48 = vmul.f32 0.0078125, %v284_v46  ;;  %v374_v49 = vmul.f32 %v2043_v45, %v2043_v45  ;;  %1280 = vmatprep.subr.bf16.mxu0 %v1405_v42  ;;  %1326 = vmatprep.subr.bf16.mxu1 %v1405_v42 }
  0xf4   : > { %v327_v50 = vmul.f32 0.0078125, %v286_v47  ;;  %v375_v13 = vmul.f32 %v2046_v10, %v2046_v10  ;;  %1281 = vmatpush3.bf16.msra.mxu0 %v1405_v42  ;;  %1334 = vmatpush3.bf16.msra.mxu1 %v1405_v42 }
  0xf5   : > { %v2053_v53 = vsub.f32 %v1913_v14, %v326_v48  ;;  %442 = vadd.xlane.f32.xlu1 %v389_v11  ;;  %412 = vadd.xlane.f32.xlu0 %v374_v49 }
  0xf6   : > { %v2056_v12 = vsub.f32 %v1916_v15, %v327_v50  ;;  %v256_v54 = vpop.xlane.xlu0 %255 }
  0xf7   : > { %v258_v55 = vpop.xlane.xlu1 %257  ;;  %v312_v56 = vmul.f32 0.0078125, %v256_v54  ;;  %v390_v57 = vmul.f32 %v2053_v53, %v2053_v53 }
  0xf8   : > { %2843 = vst [vmem:[#allocation11_spill] sm:$0xff] %v2056_v12  ;;  %v313_v58 = vmul.f32 0.0078125, %v258_v55  ;;  %v391_v15 = vmul.f32 %v2056_v12, %v2056_v12 }
  0xf9   : > { %v2063_v61 = vsub.f32 %v1921_v16, %v312_v56  ;;  %414 = vadd.xlane.f32.xlu1 %v375_v13  ;;  %444 = vadd.xlane.f32.xlu0 %v390_v57  ;;  %v1406_v13 = vld [vmem:[#allocation5 + $0x20] sm:$0xff]  }
  0xfa   : > { %v2066_v14 = vsub.f32 %v1924_v17, %v313_v58  ;;  %v288_v62 = vpop.xlane.xlu0 %287  ;;  %1282 = vmatprep.subr.bf16.mxu0 %v1406_v13  ;;  %1327 = vmatprep.subr.bf16.mxu1 %v1406_v13 }
  0xfb   : > { %2844 = vst [vmem:[#allocation12_spill] sm:$0xff] %v2063_v61  ;;  %v290_v63 = vpop.xlane.xlu1 %289  ;;  %v328_v1 = vmul.f32 0.0078125, %v288_v62  ;;  %v376_v2 = vmul.f32 %v2063_v61, %v2063_v61  ;;  %1283 = vmatpush3.bf16.msra.mxu0 %v1406_v13  ;;  %v1407_v62 = vld [vmem:[#allocation5 + $0x18] sm:$0xff]   ;;  %1335 = vmatpush3.bf16.msra.mxu1 %v1406_v13 }
  0xfc   : > { %2845 = vst [vmem:[#allocation13_spill] sm:$0xff] %v2066_v14  ;;  %v329_v5 = vmul.f32 0.0078125, %v290_v63  ;;  %v377_v6 = vmul.f32 %v2066_v14, %v2066_v14  ;;  %1284 = vmatprep.subr.bf16.mxu0 %v1407_v62  ;;  %1328 = vmatprep.subr.bf16.mxu1 %v1407_v62 }
  0xfd   : > { %v2073_v16 = vsub.f32 %v1929_v18, %v328_v1  ;;  %446 = vadd.xlane.f32.xlu1 %v391_v15  ;;  %416 = vadd.xlane.f32.xlu0 %v376_v2 }
  0xfe   : > { %v2076_v17 = vsub.f32 %v1932_v19, %v329_v5  ;;  %v260_v7 = vpop.xlane.xlu0 %259 }
  0xff   : > { %2846 = vst [vmem:[#allocation14_spill] sm:$0xff] %v2073_v16  ;;  %v262_v32 = vpop.xlane.xlu1 %261  ;;  %v314_v34 = vmul.f32 0.0078125, %v260_v7  ;;  %v392_v9 = vmul.f32 %v2073_v16, %v2073_v16  ;;  %1285 = vmatpush3.bf16.msra.mxu0 %v1407_v62  ;;  %v1408_v7 = vld [vmem:[#allocation5 + $0x10] sm:$0xff]   ;;  %1336 = vmatpush3.bf16.msra.mxu1 %v1407_v62 }
 0x100   : > { %2847 = vst [vmem:[#allocation15_spill] sm:$0xff] %v2076_v17  ;;  %v315_v38 = vmul.f32 0.0078125, %v262_v32  ;;  %v393_v39 = vmul.f32 %v2076_v17, %v2076_v17  ;;  %1286 = vmatprep.subr.bf16.mxu0 %v1408_v7  ;;  %1329 = vmatprep.subr.bf16.mxu1 %v1408_v7 }
 0x101   : > { %v2083_v18 = vsub.f32 %v1937_v20, %v314_v34  ;;  %418 = vadd.xlane.f32.xlu1 %v377_v6  ;;  %448 = vadd.xlane.f32.xlu0 %v392_v9 }
 0x102   : > { %v2086_v19 = vsub.f32 %v1940_v21, %v315_v38  ;;  %v292_v40 = vpop.xlane.xlu0 %291 }
 0x103   : > { %2848 = vst [vmem:[#allocation16_spill] sm:$0xff] %v2083_v18  ;;  %v294_v41 = vpop.xlane.xlu1 %293  ;;  %v330_v11 = vmul.f32 0.0078125, %v292_v40  ;;  %v378_v46 = vmul.f32 %v2083_v18, %v2083_v18  ;;  %1287 = vmatpush3.bf16.msra.mxu0 %v1408_v7  ;;  %v1409_v40 = vld [vmem:[#allocation5 + $0x8] sm:$0xff]   ;;  %1337 = vmatpush3.bf16.msra.mxu1 %v1408_v7 }
 0x104   : > { %2849 = vst [vmem:[#allocation17_spill] sm:$0xff] %v2086_v19  ;;  %v331_v47 = vmul.f32 0.0078125, %v294_v41  ;;  %v379_v48 = vmul.f32 %v2086_v19, %v2086_v19  ;;  %1288 = vmatprep.subr.bf16.mxu0 %v1409_v40  ;;  %1330 = vmatprep.subr.bf16.mxu1 %v1409_v40 }
 0x105   : > { %v2093_v20 = vsub.f32 %v1945_v22, %v330_v11  ;;  %450 = vadd.xlane.f32.xlu1 %v393_v39  ;;  %420 = vadd.xlane.f32.xlu0 %v378_v46 }
 0x106   : > { %v2096_v21 = vsub.f32 %v1948_v23, %v331_v47  ;;  %v264_v49 = vpop.xlane.xlu0 %263 }
 0x107   : > { %2850 = vst [vmem:[#allocation18_spill] sm:$0xff] %v2093_v20  ;;  %v266_v50 = vpop.xlane.xlu1 %265  ;;  %v316_v54 = vmul.f32 0.0078125, %v264_v49  ;;  %v394_v55 = vmul.f32 %v2093_v20, %v2093_v20  ;;  %1289 = vmatpush3.bf16.msra.mxu0 %v1409_v40  ;;  %1338 = vmatpush3.bf16.msra.mxu1 %v1409_v40 }
 0x108   : > { %2851 = vst [vmem:[#allocation19_spill] sm:$0xff] %v2096_v21  ;;  %v317_v56 = vmul.f32 0.0078125, %v266_v50  ;;  %v395_v57 = vmul.f32 %v2096_v21, %v2096_v21 }
 0x109   : > { %v2103_v22 = vsub.f32 %v1953_v24, %v316_v54  ;;  %422 = vadd.xlane.f32.xlu1 %v379_v48  ;;  %452 = vadd.xlane.f32.xlu0 %v394_v55 }
 0x10a   : > { %v2106_v23 = vsub.f32 %v1956_v25, %v317_v56  ;;  %v296_v58 = vpop.xlane.xlu0 %295 }
 0x10b   : > { %2852 = vst [vmem:[#allocation20_spill] sm:$0xff] %v2103_v22  ;;  %v298_v15 = vpop.xlane.xlu1 %297  ;;  %v332_v63 = vmul.f32 0.0078125, %v296_v58  ;;  %v380_v0 = vmul.f32 %v2103_v22, %v2103_v22 }
 0x10c   : > { %2853 = vst [vmem:[#allocation21_spill] sm:$0xff] %v2106_v23  ;;  %v333_v1 = vmul.f32 0.0078125, %v298_v15  ;;  %v381_v2 = vmul.f32 %v2106_v23, %v2106_v23 }
 0x10d   : > { %v2113_v24 = vsub.f32 %v1961_v26, %v332_v63  ;;  %454 = vadd.xlane.f32.xlu1 %v395_v57  ;;  %424 = vadd.xlane.f32.xlu0 %v380_v0 }
 0x10e   : > { %v2116_v25 = vsub.f32 %v1964_v27, %v333_v1  ;;  %v268_v5 = vpop.xlane.xlu0 %267 }
 0x10f   : > { %2854 = vst [vmem:[#allocation22_spill] sm:$0xff] %v2113_v24  ;;  %v270_v6 = vpop.xlane.xlu1 %269  ;;  %v318_v32 = vmul.f32 0.0078125, %v268_v5  ;;  %v396_v33 = vmul.f32 %v2113_v24, %v2113_v24 }
 0x110   : > { %2855 = vst [vmem:[#allocation23_spill] sm:$0xff] %v2116_v25  ;;  %v319_v34 = vmul.f32 0.0078125, %v270_v6  ;;  %v397_v9 = vmul.f32 %v2116_v25, %v2116_v25 }
 0x111   : > { %v2123_v26 = vsub.f32 %v1969_v28, %v318_v32  ;;  %426 = vadd.xlane.f32.xlu1 %v381_v2  ;;  %456 = vadd.xlane.f32.xlu0 %v396_v33 }
 0x112   : > { %v2126_v27 = vsub.f32 %v1972_v29, %v319_v34  ;;  %v300_v38 = vpop.xlane.xlu0 %299 }
 0x113   : > { %2856 = vst [vmem:[#allocation24_spill] sm:$0xff] %v2123_v26  ;;  %v302_v39 = vpop.xlane.xlu1 %301  ;;  %v334_v41 = vmul.f32 0.0078125, %v300_v38  ;;  %v382_v42 = vmul.f32 %v2123_v26, %v2123_v26 }
 0x114   : > { %2857 = vst [vmem:[#allocation25_spill] sm:$0xff] %v2126_v27  ;;  %v335_v11 = vmul.f32 0.0078125, %v302_v39  ;;  %v383_v46 = vmul.f32 %v2126_v27, %v2126_v27 }
 0x115   : > { %v2133_v28 = vsub.f32 %v1977_v30, %v334_v41  ;;  %458 = vadd.xlane.f32.xlu1 %v397_v9  ;;  %428 = vadd.xlane.f32.xlu0 %v382_v42  ;;  %v1410_v30 = vld [vmem:[#allocation5] sm:$0xff]  }
 0x116   : > { %v2136_v29 = vsub.f32 %v1980_v31, %v335_v11  ;;  %1290 = vmatprep.subr.bf16.mxu0 %v1410_v30  ;;  %1331 = vmatprep.subr.bf16.mxu1 %v1410_v30 }
 0x117   : > { %2858 = vst [vmem:[#allocation26_spill] sm:$0xff] %v2133_v28  ;;  %v398_v47 = vmul.f32 %v2133_v28, %v2133_v28  ;;  %1291 = vmatpush3.bf16.msra.mxu0 %v1410_v30  ;;  %1339 = vmatpush3.bf16.msra.mxu1 %v1410_v30 }
 0x118   : > { %2859 = vst [vmem:[#allocation27_spill] sm:$0xff] %v2136_v29  ;;  %v399_v48 = vmul.f32 %v2136_v29, %v2136_v29 }
 0x119   : > { %430 = vadd.xlane.f32.xlu1 %v383_v46  ;;  %460 = vadd.xlane.f32.xlu0 %v398_v47 }
 0x11d   : > { %462 = vadd.xlane.f32.xlu1 %v399_v48 }
 0x166   : > { %v401_v31 = vpop.xlane.xlu0 %400 }
 0x167   : > { %v464_v49 = vmul.f32 0.007874016, %v401_v31 }
 0x169   : > { %1411 = vrsqrt.f32 %v464_v49  ;;  %vm498_vm0 = vcmp.eq.f32.partialorder %v464_v49, inf  ;;  %v501_v40 = vand.u32 2147483648, %v464_v49  ;;  %vm500_vm2 = vcmp.eq.f32.partialorder %v464_v49, 0.0 }
 0x16a   : > { %v403_v50 = vpop.xlane.xlu1 %402  ;;  %v433_v13 = vpop.xlane.xlu0 %432 }
 0x16b   : > { %v465_v54 = vmul.f32 0.007874016, %v403_v50  ;;  %v2144_v57 = vmul.f32 0.007874016, %v433_v13 }
 0x16d   : > { %1413 = vrsqrt.f32 %v465_v54  ;;  %vm505_vm1 = vcmp.eq.f32.partialorder %v465_v54, inf  ;;  %v508_v47 = vand.u32 2147483648, %v465_v54  ;;  %vm507_vm3 = vcmp.eq.f32.partialorder %v465_v54, 0.0 }
 0x16e   : > { %v435_v55 = vpop.xlane.xlu1 %434  ;;  %v405_v56 = vpop.xlane.xlu0 %404  ;;  %1415 = vrsqrt.f32 %v2144_v57  ;;  %vm610_vm4 = vcmp.eq.f32.partialorder %v2144_v57, inf  ;;  %vm612_vm5 = vcmp.eq.f32.partialorder %v2144_v57, 0.0 }
 0x16f   : > { %v2146_v58 = vmul.f32 0.007874016, %v435_v55  ;;  %v2150_v6 = vmul.f32 0.007874016, %v405_v56 }
 0x171   : > { %1417 = vrsqrt.f32 %v2146_v58  ;;  %vm617_vm6 = vcmp.eq.f32.partialorder %v2146_v58, inf  ;;  %vm619_vm7 = vcmp.eq.f32.partialorder %v2146_v58, 0.0  ;;  %vm512_vm8 = vcmp.eq.f32.partialorder %v2150_v6, inf }
 0x172   : > { %v407_v15 = vpop.xlane.xlu1 %406  ;;  %v437_v62 = vpop.xlane.xlu0 %436  ;;  %1419 = vrsqrt.f32 %v2150_v6  ;;  %vm514_vm13 = vcmp.eq.f32.partialorder %v2150_v6, 0.0  ;;  %v2860_v20 = vand.u32 2147483648, %v2150_v6 }
 0x173   : > { %v2152_v34 = vmul.f32 0.007874016, %v407_v15  ;;  %v2154_v9 = vmul.f32 0.007874016, %v437_v62 }
 0x175   : > { %1421 = vrsqrt.f32 %v2152_v34  ;;  %vm519_vm9 = vcmp.eq.f32.partialorder %v2152_v34, inf  ;;  %vm624_vm10 = vcmp.eq.f32.partialorder %v2154_v9, inf  ;;  %vm521_vm15 = vcmp.eq.f32.partialorder %v2152_v34, 0.0 }
 0x176   : > { %v1412_v63 = vpop.eup %1411  ;;  %v439_v0 = vpop.xlane.xlu1 %438  ;;  %1423 = vrsqrt.f32 %v2154_v9 }
 0x177   : > { %v409_v1 = vpop.xlane.xlu0 %408  ;;  %v497_v2 = vmul.f32 %v1412_v63, %v464_v49  ;;  %v2156_v39 = vmul.f32 0.007874016, %v439_v0 }
 0x178   : > { %v2159_v42 = vmul.f32 0.007874016, %v409_v1 }
 0x179   : > { %v499_v38 = vsel %vm498_vm0, %v464_v49, %v497_v2  ;;  %1425 = vrsqrt.f32 %v2156_v39  ;;  %vm631_vm11 = vcmp.eq.f32.partialorder %v2156_v39, inf }
 0x17a   : > { %v1414_v5 = vpop.eup %1413  ;;  %v411_v7 = vpop.xlane.xlu1 %410  ;;  %v502_v50 = vsel %vm500_vm2, %v501_v40, %v499_v38  ;;  %1427 = vrsqrt.f32 %v2159_v42  ;;  %v613_v40 = vand.u32 2147483648, %v2144_v57  ;;  %vm526_vm12 = vcmp.eq.f32.partialorder %v2159_v42, inf }
 0x17b   : > { %v441_v32 = vpop.xlane.xlu0 %440  ;;  %v504_v33 = vmul.f32 %v1414_v5, %v465_v54  ;;  %v2162_v48 = vmul.f32 0.007874016, %v411_v7  ;;  %v1416_v30 = vpop.eup %1415 }
 0x17c   : > { %v2165_v31 = vmul.f32 0.007874016, %v441_v32  ;;  %v609_v63 = vmul.f32 %v1416_v30, %v2144_v57 }
 0x17d   : > { %v506_v41 = vsel %vm505_vm1, %v465_v54, %v504_v33  ;;  %1429 = vrsqrt.f32 %v2162_v48  ;;  %v720_v54 = vadd.f32 1e-06, %v502_v50  ;;  %vm533_vm14 = vcmp.eq.f32.partialorder %v2162_v48, inf }
 0x17e   : > { %v443_v11 = vpop.xlane.xlu1 %442  ;;  %v509_v55 = vsel %vm507_vm3, %v508_v47, %v506_v41  ;;  %v1418_v62 = vpop.eup %1417  ;;  %1431 = vrsqrt.f32 %v2165_v31  ;;  %v611_v33 = vsel %vm610_vm4, %v2144_v57, %v609_v63  ;;  %vm638_vm0 = vcmp.eq.f32.partialorder %v2165_v31, inf }
 0x17f   : > { %v413_v46 = vpop.xlane.xlu0 %412  ;;  %v2168_v13 = vmul.f32 0.007874016, %v443_v11  ;;  %v721_v0 = vadd.f32 1e-06, %v509_v55  ;;  %v616_v2 = vmul.f32 %v1418_v62, %v2146_v58  ;;  %v620_v11 = vand.u32 2147483648, %v2146_v58  ;;  %v1420_v50 = vpop.eup %1419 }
 0x180   : > { %v2171_v49 = vmul.f32 0.007874016, %v413_v46  ;;  %v614_v57 = vsel %vm612_vm5, %v613_v40, %v611_v33  ;;  %v511_v33 = vmul.f32 %v1420_v50, %v2150_v6 }
 0x181   : > { %1433 = vrsqrt.f32 %v2168_v13  ;;  %v618_v46 = vsel %vm617_vm6, %v2146_v58, %v616_v2  ;;  %vm645_vm1 = vcmp.eq.f32.partialorder %v2168_v13, inf }
 0x182   : > { %v415_v56 = vpop.xlane.xlu1 %414  ;;  %1435 = vrsqrt.f32 %v2171_v49  ;;  %v621_v2 = vsel %vm619_vm7, %v620_v11, %v618_v46  ;;  %vm540_vm2 = vcmp.eq.f32.partialorder %v2171_v49, inf  ;;  %vm626_vm7 = vcmp.eq.f32.partialorder %v2154_v9, 0.0 }
 0x183   : > { %v445_v15 = vpop.xlane.xlu0 %444  ;;  %v2177_v1 = vmul.f32 0.007874016, %v415_v56  ;;  %1437 = vrcp.f32 %v720_v54 }
 0x184   : > { %v2182_v5 = vmul.f32 0.007874016, %v445_v15  ;;  %1439 = vrcp.f32 %v721_v0  ;;  %v1422_v15 = vpop.eup %1421 }
 0x185   : > { %1441 = vrsqrt.f32 %v2177_v1  ;;  %v1424_v54 = vpop.eup %1423  ;;  %v518_v0 = vmul.f32 %v1422_v15, %v2152_v34  ;;  %vm547_vm3 = vcmp.eq.f32.partialorder %v2177_v1, inf }
 0x186   : > { %v447_v7 = vpop.xlane.xlu1 %446  ;;  %1443 = vrsqrt.f32 %v2182_v5  ;;  %vm652_vm4 = vcmp.eq.f32.partialorder %v2182_v5, inf }
 0x187   : > { %v417_v32 = vpop.xlane.xlu0 %416  ;;  %v2185_v38 = vmul.f32 0.007874016, %v447_v7  ;;  %v736_v7 = vadd.f32 1e-06, %v614_v57  ;;  %v623_v57 = vmul.f32 %v1424_v54, %v2154_v9  ;;  %v513_v54 = vsel %vm512_vm8, %v2150_v6, %v511_v33 }
 0x188   : > { %v2189_v41 = vmul.f32 0.007874016, %v417_v32  ;;  %v1426_v32 = vpop.eup %1425  ;;  %v516_v19 = vsel %vm514_vm13, %v2860_v20, %v513_v54  ;;  %vm633_vm8 = vcmp.eq.f32.partialorder %v2156_v39, 0.0  ;;  %vm528_vm13 = vcmp.eq.f32.partialorder %v2159_v42, 0.0 }
 0x189   : > { %1445 = vrsqrt.f32 %v2185_v38  ;;  %v1428_v55 = vpop.eup %1427  ;;  %v630_v15 = vmul.f32 %v1426_v32, %v2156_v39  ;;  %v520_v32 = vsel %vm519_vm9, %v2152_v34, %v518_v0  ;;  %vm659_vm5 = vcmp.eq.f32.partialorder %v2185_v38, inf }
 0x18a   : > { %v419_v47 = vpop.xlane.xlu1 %418  ;;  %1447 = vrsqrt.f32 %v2189_v41  ;;  %v1430_v46 = vpop.eup %1429  ;;  %v525_v29 = vmul.f32 %v1428_v55, %v2159_v42  ;;  %vm554_vm6 = vcmp.eq.f32.partialorder %v2189_v41, inf }
 0x18b   : > { %v449_v30 = vpop.xlane.xlu0 %448  ;;  %v2201_v56 = vmul.f32 0.007874016, %v419_v47  ;;  %v737_v47 = vadd.f32 1e-06, %v621_v2  ;;  %v1432_v40 = vpop.eup %1431 }
 0x18c   : > { %v2206_v63 = vmul.f32 0.007874016, %v449_v30 }
 0x18d   : > { %1449 = vrsqrt.f32 %v2201_v56  ;;  %vm561_vm9 = vcmp.eq.f32.partialorder %v2201_v56, inf }
 0x18e   : > { %v451_v30 = vpop.xlane.xlu1 %450  ;;  %1451 = vrsqrt.f32 %v2206_v63  ;;  %v1434_v58 = vpop.eup %1433 }
 0x18f   : > { %v421_v62 = vpop.xlane.xlu0 %420  ;;  %v2220_v11 = vmul.f32 0.007874016, %v451_v30  ;;  %1453 = vrcp.f32 %v736_v7  ;;  %v1436_v27 = vpop.eup %1435  ;;  %v2257_v7 = vsel %vm631_vm11, %v2156_v39, %v630_v15  ;;  %v2265_v30 = vsel %vm526_vm12, %v2159_v42, %v525_v29 }
 0x190   : > { %v2225_v50 = vmul.f32 0.007874016, %v421_v62  ;;  %v1438_v55 = vpop.eup %1437  ;;  %v2248_v62 = vsel %vm624_vm10, %v2154_v9, %v623_v57  ;;  %v644_v22 = vmul.f32 %v1434_v58, %v2168_v13  ;;  %vm666_vm10 = vcmp.eq.f32.partialorder %v2206_v63, inf }
 0x191   : > { %1455 = vrsqrt.f32 %v2220_v11  ;;  %v1440_v0 = vpop.eup %1439  ;;  %v784_v24 = vmul.f32 %v1438_v55, %v1985_v36  ;;  %v539_v36 = vmul.f32 %v1436_v27, %v2171_v49  ;;  %v722_v55 = vadd.f32 1e-06, %v516_v19 }
 0x192   : > { %v423_v2 = vpop.xlane.xlu1 %422  ;;  %1457 = vrsqrt.f32 %v2225_v50  ;;  %v1442_v57 = vpop.eup %1441  ;;  %vm673_vm11 = vcmp.eq.f32.partialorder %v2220_v11, inf  ;;  %vm568_vm12 = vcmp.eq.f32.partialorder %v2225_v50, inf }
 0x193   : > { %v453_v28 = vpop.xlane.xlu0 %452  ;;  %v2243_v33 = vmul.f32 0.007874016, %v423_v2  ;;  %1459 = vrcp.f32 %v737_v47  ;;  %v532_v2 = vmul.f32 %v1430_v46, %v2162_v48  ;;  %v1444_v25 = vpop.eup %1443 }
 0x194   : > { %v2252_v26 = vmul.f32 0.007874016, %v453_v28  ;;  %v637_v28 = vmul.f32 %v1432_v40, %v2165_v31  ;;  %v785_v40 = vmul.f32 %v1440_v0, %v1993_v43  ;;  %v2861_v0 = vand.u32 2147483648, %v2152_v34 }
 0x195   : > { %1461 = vrsqrt.f32 %v2243_v33  ;;  %v2289_v29 = vsel %vm533_vm14, %v2162_v48, %v532_v2  ;;  %v651_v27 = vmul.f32 %v1444_v25, %v2182_v5  ;;  %vm535_vm14 = vcmp.eq.f32.partialorder %v2162_v48, 0.0 }
 0x196   : > { %1463 = vrsqrt.f32 %v2252_v26  ;;  %v455_v46 = vpop.xlane.xlu1 %454  ;;  %v1446_v23 = vpop.eup %1445  ;;  %v816_v43 = vpack.c.bf16 %v785_v40, %v784_v24  ;;  %v2297_v58 = vsel %vm638_vm0, %v2165_v31, %v637_v28  ;;  %v523_v19 = vsel %vm521_vm15, %v2861_v0, %v520_v32 }
 0x197   : > { %v425_v15 = vpop.xlane.xlu0 %424  ;;  %v2278_v21 = vmul.f32 0.007874016, %v455_v46  ;;  %v1448_v18 = vpop.eup %1447  ;;  %v546_v24 = vmul.f32 %v1442_v57, %v2177_v1  ;;  %v2312_v46 = vsel %vm645_vm1, %v2168_v13, %v644_v22  ;;  %v2323_v57 = vsel %vm540_vm2, %v2171_v49, %v539_v36 }
 0x198   : > { %v2280_v47 = vmul.f32 0.007874016, %v425_v15  ;;  %1292 = vmatprep.mubr.bf16.mxu0 %v816_v43  ;;  %v658_v15 = vmul.f32 %v1446_v23, %v2185_v38  ;;  %v553_v34 = vmul.f32 %v1448_v18, %v2189_v41  ;;  %v723_v22 = vadd.f32 1e-06, %v523_v19 }
 0x199   : > { %1465 = vrsqrt.f32 %v2278_v21  ;;  %v2336_v36 = vsel %vm547_vm3, %v2177_v1, %v546_v24  ;;  %vm575_vm15 = vcmp.eq.f32.partialorder %v2243_v33, inf  ;;  %vm680_vm0 = vcmp.eq.f32.partialorder %v2252_v26, inf }
 0x19a   : > { %v427_v6 = vpop.xlane.xlu1 %426  ;;  %1467 = vrsqrt.f32 %v2280_v47  ;;  %v1450_v28 = vpop.eup %1449  ;;  %v2349_v23 = vsel %vm659_vm5, %v2185_v38, %v658_v15  ;;  %v2354_v24 = vsel %vm554_vm6, %v2189_v41, %v553_v34  ;;  %vm687_vm1 = vcmp.eq.f32.partialorder %v2278_v21, inf }
 0x19b   : > { %v457_v54 = vpop.xlane.xlu0 %456  ;;  %v2318_v25 = vmul.f32 0.007874016, %v427_v6  ;;  %v1452_v32 = vpop.eup %1451  ;;  %1469 = vrcp.f32 %v722_v55  ;;  %v2341_v55 = vsel %vm652_vm4, %v2182_v5, %v651_v27  ;;  %v560_v27 = vmul.f32 %v1450_v28, %v2201_v56 }
 0x19c   : > { %v2325_v40 = vmul.f32 0.007874016, %v457_v54  ;;  %v1454_v43 = vpop.eup %1453  ;;  %v665_v20 = vmul.f32 %v1452_v32, %v2206_v63  ;;  %v690_v28 = vand.u32 2147483648, %v2278_v21  ;;  %vm582_vm2 = vcmp.eq.f32.partialorder %v2280_v47, inf }
 0x19d   : > { %1471 = vrsqrt.f32 %v2318_v25  ;;  %v800_v18 = vmul.f32 %v1454_v43, %v1988_v37  ;;  %vm640_vm3 = vcmp.eq.f32.partialorder %v2165_v31, 0.0  ;;  %vm647_vm4 = vcmp.eq.f32.partialorder %v2168_v13, 0.0 }
 0x19e   : > { %v459_v6 = vpop.xlane.xlu1 %458  ;;  %v1456_v2 = vpop.eup %1455  ;;  %1473 = vrsqrt.f32 %v2325_v40  ;;  %vm589_vm5 = vcmp.eq.f32.partialorder %v2318_v25, inf  ;;  %vm542_vm6 = vcmp.eq.f32.partialorder %v2171_v49, 0.0 }
 0x19f   : > { %v429_v0 = vpop.xlane.xlu0 %428  ;;  %v1458_v19 = vpop.eup %1457  ;;  %1475 = vrcp.f32 %v723_v22  ;;  %v2361_v17 = vmul.f32 0.007874016, %v459_v6  ;;  %v672_v34 = vmul.f32 %v1456_v2, %v2220_v11  ;;  %v2862_v22 = vand.u32 2147483648, %v2154_v9 }
 0x1a0   : > { %v1460_v54 = vpop.eup %1459  ;;  %v2363_v15 = vmul.f32 0.007874016, %v429_v0  ;;  %v567_v12 = vmul.f32 %v1458_v19, %v2225_v50  ;;  %v2863_v6 = vand.u32 2147483648, %v2156_v39  ;;  %v2390_v9 = vsel %vm561_vm9, %v2201_v56, %v560_v27 }
 0x1a1   : > { %v801_v32 = vmul.f32 %v1460_v54, %v1996_v44  ;;  %1477 = vrsqrt.f32 %v2361_v17  ;;  %v628_v2 = vsel %vm626_vm7, %v2862_v22, %v2248_v62  ;;  %v585_v44 = vand.u32 2147483648, %v2280_v47 }
 0x1a2   : > { %v1462_v16 = vpop.eup %1461  ;;  %v431_v14 = vpop.xlane.xlu1 %430  ;;  %v635_v37 = vsel %vm633_vm8, %v2863_v6, %v2257_v7  ;;  %1479 = vrsqrt.f32 %v2363_v15  ;;  %v2395_v39 = vsel %vm666_vm10, %v2206_v63, %v665_v20  ;;  %v738_v54 = vadd.f32 1e-06, %v628_v2 }
 0x1a3   : > { %v1464_v61 = vpop.eup %1463  ;;  %v824_v43 = vpack.c.bf16 %v801_v32, %v800_v18  ;;  %v461_v0 = vpop.xlane.xlu0 %460  ;;  %v574_v62 = vmul.f32 %v1462_v16, %v2243_v33  ;;  %v739_v19 = vadd.f32 1e-06, %v635_v37  ;;  %v2401_v32 = vmul.f32 0.007874016, %v431_v14 }
 0x1a4   : > { %v679_v18 = vmul.f32 %v1464_v61, %v2252_v26  ;;  %vm549_vm7 = vcmp.eq.f32.partialorder %v2177_v1, 0.0  ;;  %vm654_vm8 = vcmp.eq.f32.partialorder %v2182_v5, 0.0  ;;  %vm661_vm9 = vcmp.eq.f32.partialorder %v2185_v38, 0.0 }
 0x1a5   : > { %1308 = vmatprep.mubr.bf16.mxu1 %v824_v43  ;;  %v2410_v61 = vsel %vm673_vm11, %v2220_v11, %v672_v34  ;;  %v2415_v14 = vsel %vm568_vm12, %v2225_v50, %v567_v12  ;;  %v2418_v20 = vmul.f32 0.007874016, %v461_v0  ;;  %1481 = vrcp.f32 %v738_v54 }
 0x1a6   : > { %v463_v27 = vpop.xlane.xlu1 %462  ;;  %v1466_v22 = vpop.eup %1465  ;;  %v2864_v37 = vand.u32 2147483648, %v2159_v42  ;;  %vm694_vm10 = vcmp.eq.f32.partialorder %v2325_v40, inf  ;;  %1483 = vrcp.f32 %v739_v19  ;;  %v2865_v0 = vand.u32 2147483648, %v2162_v48 }
 0x1a7   : > { %v1468_v2 = vpop.eup %1467  ;;  %v686_v6 = vmul.f32 %v1466_v22, %v2278_v21  ;;  %v2426_v43 = vmul.f32 0.007874016, %v463_v27  ;;  %vm556_vm11 = vcmp.eq.f32.partialorder %v2189_v41, 0.0  ;;  %v2440_v42 = vsel %vm575_vm15, %v2243_v33, %v574_v62 }
 0x1a8   : > { %v530_v34 = vsel %vm528_vm13, %v2864_v37, %v2265_v30  ;;  %v581_v7 = vmul.f32 %v1468_v2, %v2280_v47  ;;  %v537_v54 = vsel %vm535_vm14, %v2865_v0, %v2289_v29  ;;  %v1470_v22 = vpop.eup %1469  ;;  %v2445_v30 = vsel %vm680_vm0, %v2252_v26, %v679_v18 }
 0x1a9   : > { %1485 = vrsqrt.f32 %v2401_v32  ;;  %vm563_vm12 = vcmp.eq.f32.partialorder %v2201_v56, 0.0  ;;  %v2453_v48 = vsel %vm687_vm1, %v2278_v21, %v686_v6  ;;  %vm701_vm13 = vcmp.eq.f32.partialorder %v2361_v17, inf }
 0x1aa   : > { %v1472_v27 = vpop.eup %1471  ;;  %1487 = vrsqrt.f32 %v2418_v20  ;;  %v724_v62 = vadd.f32 1e-06, %v530_v34  ;;  %vm668_vm14 = vcmp.eq.f32.partialorder %v2206_v63, 0.0  ;;  %vm675_vm15 = vcmp.eq.f32.partialorder %v2220_v11, 0.0 }
 0x1ab   : > { %v1474_v18 = vpop.eup %1473  ;;  %v588_v2 = vmul.f32 %v1472_v27, %v2318_v25  ;;  %v711_v37 = vand.u32 2147483648, %v2418_v20  ;;  %v725_v0 = vadd.f32 1e-06, %v537_v54  ;;  %1489 = vrsqrt.f32 %v2426_v43 }
 0x1ac   : > { %v2466_v6 = vsel %vm582_vm2, %v2280_v47, %v581_v7  ;;  %v693_v29 = vmul.f32 %v1474_v18, %v2325_v40  ;;  %v786_v34 = vmul.f32 %v1470_v22, %v2003_v51  ;;  %1491 = vrcp.f32 %v724_v62  ;;  %v1476_v19 = vpop.eup %1475 }
 0x1ad   : > { %vm570_vm0 = vcmp.eq.f32.partialorder %v2225_v50, 0.0  ;;  %vm577_vm1 = vcmp.eq.f32.partialorder %v2243_v33, 0.0  ;;  %1493 = vrcp.f32 %v725_v0  ;;  %v718_v54 = vand.u32 2147483648, %v2426_v43 }
 0x1ae   : > { %v2866_v27 = vand.u32 2147483648, %v2165_v31  ;;  %v2867_v18 = vand.u32 2147483648, %v2168_v13  ;;  %v2486_v22 = vsel %vm589_vm5, %v2318_v25, %v588_v2  ;;  %v787_v62 = vmul.f32 %v1476_v19, %v2006_v52  ;;  %v1478_v16 = vpop.eup %1477 }
 0x1af   : > { %vm682_vm2 = vcmp.eq.f32.partialorder %v2252_v26, 0.0  ;;  %v2868_v31 = vand.u32 2147483648, %v2171_v49  ;;  %v2869_v13 = vand.u32 2147483648, %v2177_v1  ;;  %v2870_v52 = vand.u32 2147483648, %v2182_v5  ;;  %v1480_v49 = vpop.eup %1479 }
 0x1b0   : > { %v642_v7 = vsel %vm640_vm3, %v2866_v27, %v2297_v58  ;;  %v649_v51 = vsel %vm647_vm4, %v2867_v18, %v2312_v46  ;;  %v2871_v2 = vand.u32 2147483648, %v2185_v38  ;;  %vm689_vm3 = vcmp.eq.f32.partialorder %v2278_v21, 0.0 }
 0x1b1   : > { %v740_v0 = vadd.f32 1e-06, %v642_v7  ;;  %v741_v12 = vadd.f32 1e-06, %v649_v51  ;;  %v544_v58 = vsel %vm542_vm6, %v2868_v31, %v2323_v57  ;;  %v551_v46 = vsel %vm549_vm7, %v2869_v13, %v2336_v36 }
 0x1b2   : > { %v656_v19 = vsel %vm654_vm8, %v2870_v52, %v2341_v55  ;;  %v663_v27 = vsel %vm661_vm9, %v2871_v2, %v2349_v23  ;;  %v817_v57 = vpack.c.bf16 %v787_v62, %v786_v34  ;;  %v700_v7 = vmul.f32 %v1478_v16, %v2361_v17  ;;  %v1482_v62 = vpop.eup %1481 }
 0x1b3   : > { %vm596_vm4 = vcmp.eq.f32.partialorder %v2363_v15, inf  ;;  %1495 = vrcp.f32 %v740_v0  ;;  %v726_v1 = vadd.f32 1e-06, %v544_v58  ;;  %v2516_v5 = vsel %vm694_vm10, %v2325_v40, %v693_v29  ;;  %v1484_v31 = vpop.eup %1483 }
 0x1b4   : > { %vm708_vm5 = vcmp.eq.f32.partialorder %v2418_v20, inf  ;;  %1497 = vrcp.f32 %v741_v12  ;;  %v727_v38 = vadd.f32 1e-06, %v551_v46  ;;  %v742_v23 = vadd.f32 1e-06, %v656_v19  ;;  %1293 = vmatmul.mubr.bf16.vlgmr.msra.gmra.mxu0 %v817_v57 }
 0x1b5   : > { %v595_v36 = vmul.f32 %v1480_v49, %v2363_v15  ;;  %vm710_vm6 = vcmp.eq.f32.partialorder %v2418_v20, 0.0  ;;  %vm715_vm7 = vcmp.eq.f32.partialorder %v2426_v43, inf  ;;  %1499 = vrcp.f32 %v726_v1 }
 0x1b6   : > { %v743_v55 = vadd.f32 1e-06, %v663_v27  ;;  %v2872_v16 = vand.u32 2147483648, %v2189_v41  ;;  %v2530_v12 = vsel %vm701_vm13, %v2361_v17, %v700_v7  ;;  %vm603_vm8 = vcmp.eq.f32.partialorder %v2401_v32, inf  ;;  %v1486_v52 = vpop.eup %1485 }
 0x1b7   : > { %1501 = vrcp.f32 %v727_v38  ;;  %v2873_v34 = vand.u32 2147483648, %v2201_v56  ;;  %vm584_vm9 = vcmp.eq.f32.partialorder %v2280_v47, 0.0  ;;  %v2875_v56 = vand.u32 2147483648, %v2220_v11  ;;  %v1488_v19 = vpop.eup %1487 }
 0x1b8   : > { %v558_v29 = vsel %vm556_vm11, %v2872_v16, %v2354_v24  ;;  %vm717_vm11 = vcmp.eq.f32.partialorder %v2426_v43, 0.0  ;;  %1503 = vrcp.f32 %v742_v23  ;;  %v2874_v24 = vand.u32 2147483648, %v2206_v63 }
 0x1b9   : > { %v565_v18 = vsel %vm563_vm12, %v2873_v34, %v2390_v9  ;;  %v728_v51 = vadd.f32 1e-06, %v558_v29  ;;  %v677_v9 = vsel %vm675_vm15, %v2875_v56, %v2410_v61  ;;  %v802_v58 = vmul.f32 %v1482_v62, %v2013_v59 }
 0x1ba   : > { %v729_v41 = vadd.f32 1e-06, %v565_v18  ;;  %v670_v0 = vsel %vm668_vm14, %v2874_v24, %v2395_v39  ;;  %1505 = vrcp.f32 %v743_v55  ;;  %v745_v46 = vadd.f32 1e-06, %v677_v9 }
 0x1bb   : > { %v744_v13 = vadd.f32 1e-06, %v670_v0  ;;  %vm696_vm12 = vcmp.eq.f32.partialorder %v2325_v40, 0.0  ;;  %vm703_vm13 = vcmp.eq.f32.partialorder %v2361_v17, 0.0  ;;  %vm598_vm10 = vcmp.eq.f32.partialorder %v2363_v15, 0.0 }
 0x1bc   : > { %v803_v63 = vmul.f32 %v1484_v31, %v2016_v60  ;;  %1507 = vrcp.f32 %v728_v51  ;;  %v2876_v11 = vand.u32 2147483648, %v2225_v50  ;;  %v2877_v59 = vand.u32 2147483648, %v2243_v33  ;;  %v1490_v60 = vpop.eup %1489 }
 0x1bd   : > { %v602_v2 = vmul.f32 %v1486_v52, %v2401_v32  ;;  %1509 = vrcp.f32 %v729_v41  ;;  %vm605_vm14 = vcmp.eq.f32.partialorder %v2401_v32, 0.0  ;;  %v707_v7 = vmul.f32 %v1488_v19, %v2418_v20 }
 0x1be   : > { %v572_v39 = vsel %vm570_vm0, %v2876_v11, %v2415_v14  ;;  %v579_v61 = vsel %vm577_vm1, %v2877_v59, %v2440_v42  ;;  %v825_v57 = vpack.c.bf16 %v803_v63, %v802_v58  ;;  %1511 = vrcp.f32 %v744_v13  ;;  %v1492_v14 = vpop.eup %1491  ;;  %v2885_v11 = vld [vmem:[#allocation11_spill] sm:$0xff] }
 0x1bf   : > { %v730_v27 = vadd.f32 1e-06, %v572_v39  ;;  %v731_v49 = vadd.f32 1e-06, %v579_v61  ;;  %v2878_v50 = vand.u32 2147483648, %v2252_v26  ;;  %v597_v42 = vsel %vm596_vm4, %v2363_v15, %v595_v36  ;;  %v1494_v23 = vpop.eup %1493 }
 0x1c0   : > { %v714_v1 = vmul.f32 %v1490_v60, %v2426_v43  ;;  %1513 = vrcp.f32 %v745_v46  ;;  %v691_v38 = vsel %vm689_vm3, %v690_v28, %v2453_v48  ;;  %1309 = vmatmul.mubr.bf16.vlgmr.msra.gmra.mxu1 %v825_v57  ;;  %v709_v26 = vsel %vm708_vm5, %v2418_v20, %v707_v7  ;;  %v1496_v29 = vpop.eup %1495  ;;  %v2888_v7 = vld [vmem:[#allocation14_spill] sm:$0xff] }
 0x1c1   : > { %v684_v33 = vsel %vm682_vm2, %v2878_v50, %v2445_v30  ;;  %v788_v30 = vmul.f32 %v1492_v14, %v2023_v3  ;;  %1515 = vrcp.f32 %v730_v27  ;;  %v712_v36 = vsel %vm710_vm6, %v711_v37, %v709_v26  ;;  %v1498_v51 = vpop.eup %1497  ;;  %v2889_v50 = vld [vmem:[#allocation15_spill] sm:$0xff]  ;;  %v2891_v26 = vld [vmem:[#allocation17_spill] sm:$0xff] }
 0x1c2   : > { %v746_v55 = vadd.f32 1e-06, %v684_v33  ;;  %v789_v16 = vmul.f32 %v1494_v23, %v2026_v4  ;;  %v716_v21 = vsel %vm715_vm7, %v2426_v43, %v714_v1  ;;  %1517 = vrcp.f32 %v731_v49  ;;  %v1500_v43 = vpop.eup %1499 }
 0x1c3   : > { %v604_v28 = vsel %vm603_vm8, %v2401_v32, %v602_v2  ;;  %v750_v48 = vadd.f32 1e-06, %v712_v36  ;;  %v747_v3 = vadd.f32 1e-06, %v691_v38  ;;  %v719_v20 = vsel %vm717_vm11, %v718_v54, %v716_v21  ;;  %v2887_v2 = vld [vmem:[#allocation13_spill] sm:$0xff]  ;;  %v2890_v38 = vld [vmem:[#allocation16_spill] sm:$0xff] }
 0x1c4   : > { %1519 = vrcp.f32 %v746_v55  ;;  %v818_v34 = vpack.c.bf16 %v789_v16, %v788_v30  ;;  %v586_v4 = vsel %vm584_vm9, %v585_v44, %v2466_v6  ;;  %v2879_v37 = vand.u32 2147483648, %v2318_v25  ;;  %v1502_v0 = vpop.eup %1501  ;;  %v2892_v16 = vld [vmem:[#allocation18_spill] sm:$0xff] }
 0x1c5   : > { %vm2880_vm15 = vcmp.eq.f32.partialorder %v2318_v25, 0.0  ;;  %v804_v62 = vmul.f32 %v1496_v29, %v2033_v35  ;;  %1521 = vrcp.f32 %v747_v3  ;;  %v732_v41 = vadd.f32 1e-06, %v586_v4  ;;  %v1504_v31 = vpop.eup %1503  ;;  %v2894_v4 = vld [vmem:[#allocation20_spill] sm:$0xff] }
 0x1c6   : > { %v593_v18 = vsel %vm2880_vm15, %v2879_v37, %v2486_v22  ;;  %1296 = vmatprep.mubr.bf16.mxu0 %v818_v34  ;;  %v805_v54 = vmul.f32 %v1498_v51, %v2036_v8  ;;  %v2881_v47 = vand.u32 2147483648, %v2325_v40  ;;  %v2882_v25 = vand.u32 2147483648, %v2361_v17 }
 0x1c7   : > { %v733_v24 = vadd.f32 1e-06, %v593_v18  ;;  %v2883_v35 = vand.u32 2147483648, %v2363_v15  ;;  %v790_v8 = vmul.f32 %v1500_v43, %v2043_v45  ;;  %1523 = vrcp.f32 %v732_v41  ;;  %v2895_v18 = vld [vmem:[#allocation21_spill] sm:$0xff]  ;;  %v2896_v43 = vld [vmem:[#allocation22_spill] sm:$0xff] }
 0x1c8   : > { %v698_v44 = vsel %vm696_vm12, %v2881_v47, %v2516_v5  ;;  %v705_v6 = vsel %vm703_vm13, %v2882_v25, %v2530_v12  ;;  %v826_v40 = vpack.c.bf16 %v805_v54, %v804_v62  ;;  %v791_v5 = vmul.f32 %v1502_v0, %v2046_v10  ;;  %v1506_v12 = vpop.eup %1505  ;;  %v2897_v47 = vld [vmem:[#allocation23_spill] sm:$0xff] }
 0x1c9   : > { %v600_v22 = vsel %vm598_vm10, %v2883_v35, %v597_v42  ;;  %v748_v56 = vadd.f32 1e-06, %v698_v44  ;;  %v749_v9 = vadd.f32 1e-06, %v705_v6  ;;  %1525 = vrcp.f32 %v733_v24  ;;  %v1508_v52 = vpop.eup %1507 }
 0x1ca   : > { %v2884_v58 = vand.u32 2147483648, %v2401_v32  ;;  %v751_v13 = vadd.f32 1e-06, %v719_v20  ;;  %v734_v15 = vadd.f32 1e-06, %v600_v22  ;;  %1312 = vmatprep.mubr.bf16.mxu1 %v826_v40  ;;  %v819_v45 = vpack.c.bf16 %v791_v5, %v790_v8  ;;  %v1510_v10 = vpop.eup %1509  ;;  %v2886_v32 = vld [vmem:[#allocation12_spill] sm:$0xff] }
 0x1cb   : > { %1527 = vrcp.f32 %v748_v56  ;;  %v806_v63 = vmul.f32 %v1504_v31, %v2053_v53  ;;  %v807_v39 = vmul.f32 %v1506_v12, %v2885_v11  ;;  %v1512_v59 = vpop.eup %1511  ;;  %v792_v19 = vmul.f32 %v1508_v52, %v2886_v32  ;;  %v2898_v22 = vld [vmem:[#allocation24_spill] sm:$0xff]  ;;  %v2899_v8 = vld [vmem:[#allocation25_spill] sm:$0xff]  ;;  %v2900_v40 = vld [vmem:[#allocation26_spill] sm:$0xff] }
 0x1cc   : > { %v607_v17 = vsel %vm605_vm14, %v2884_v58, %v604_v28  ;;  %1529 = vrcp.f32 %v749_v9  ;;  %1297 = vmatmul.mubr.bf16.gmra.mxu0 %v819_v45  ;;  %v793_v27 = vmul.f32 %v1510_v10, %v2887_v2  ;;  %v808_v53 = vmul.f32 %v1512_v59, %v2888_v7  ;;  %v2893_v28 = vld [vmem:[#allocation19_spill] sm:$0xff]  ;;  %v1539_v45 = vld [vmem:[%s1846_s29 + $0x10] sm:$0xff] }
 0x1cd   : > { %v735_v46 = vadd.f32 1e-06, %v607_v17  ;;  %1531 = vrcp.f32 %v734_v15  ;;  %v827_v61 = vpack.c.bf16 %v807_v39, %v806_v63  ;;  %v1514_v49 = vpop.eup %1513  ;;  %v2901_v58 = vld [vmem:[#allocation27_spill] sm:$0xff] }
 0x1ce   : > { %v1516_v60 = vpop.eup %1515  ;;  %v820_v57 = vpack.c.bf16 %v793_v27, %v792_v19  ;;  %v809_v33 = vmul.f32 %v1514_v49, %v2889_v50  ;;  %v1540_v10 = vld [vmem:[%s1846_s29] sm:$0xff]  ;;  %v1541_v19 = vld [vmem:[%s1846_s29 + $0x18] sm:$0xff]  ;;  %v1543_v50 = vld [vmem:[%s1846_s29 + $0x90] sm:$0xff] }
 0x1cf   : > { %1533 = vrcp.f32 %v735_v46  ;;  %1313 = vmatmul.mubr.bf16.gmra.mxu1 %v827_v61  ;;  %v1518_v14 = vpop.eup %1517  ;;  %v794_v23 = vmul.f32 %v1516_v60, %v2890_v38 }
 0x1d0   : > { %1535 = vrcp.f32 %v750_v48  ;;  %1300 = vmatprep.mubr.bf16.mxu0 %v820_v57  ;;  %v828_v1 = vpack.c.bf16 %v809_v33, %v808_v53  ;;  %v795_v30 = vmul.f32 %v1518_v14, %v2891_v26  ;;  %v1542_v57 = vld [vmem:[%s1846_s29 + $0x8] sm:$0xff] }
 0x1d1   : > { %1537 = vrcp.f32 %v751_v13  ;;  %v1520_v42 = vpop.eup %1519  ;;  %v2655_v13 = vld [vmem:[%s2809_s2] ss:$0 sm:$0xff] }
 0x1d2   : > { %v1522_v55 = vpop.eup %1521  ;;  %1316 = vmatprep.mubr.bf16.mxu1 %v828_v1  ;;  %v821_v36 = vpack.c.bf16 %v795_v30, %v794_v23  ;;  %v810_v21 = vmul.f32 %v1520_v42, %v2892_v16  ;;  %v1544_v1 = vld [vmem:[%s1846_s29 + $0x80] sm:$0xff]  ;;  %v1545_v30 = vld [vmem:[%s1846_s29 + $0x98] sm:$0xff]  ;;  %v1546_v16 = vld [vmem:[%s1846_s29 + $0x88] sm:$0xff] }
 0x1d3   : > { %v811_v48 = vmul.f32 %v1522_v55, %v2893_v28 }
 0x1d4   : > { %v1524_v3 = vpop.eup %1523  ;;  %1301 = vmatmul.mubr.bf16.gmra.mxu0 %v821_v36 }
 0x1d5   : > { %v829_v34 = vpack.c.bf16 %v811_v48, %v810_v21  ;;  %v796_v37 = vmul.f32 %v1524_v3, %v2894_v4 }
 0x1d6   : > { %v1526_v29 = vpop.eup %1525 }
 0x1d7   : > { %v797_v51 = vmul.f32 %v1526_v29, %v2895_v18  ;;  %1317 = vmatmul.mubr.bf16.gmra.mxu1 %v829_v34  ;;  %v1547_v34 = vld [vmem:[%s1846_s29 + $0x30] sm:$0xff] }
 0x1d8   : > { %v1528_v20 = vpop.eup %1527 }
 0x1d9   : > { %v1530_v62 = vpop.eup %1529  ;;  %v822_v24 = vpack.c.bf16 %v797_v51, %v796_v37  ;;  %v812_v54 = vmul.f32 %v1528_v20, %v2896_v43  ;;  %v1549_v43 = vld [vmem:[%s1846_s29 + $0xb0] sm:$0xff] }
 0x1da   : > { %v1532_v41 = vpop.eup %1531  ;;  %v813_v44 = vmul.f32 %v1530_v62, %v2897_v47  ;;  %v1548_v62 = vld [vmem:[%s1846_s29 + $0x20] sm:$0xff] }
 0x1db   : > { %1304 = vmatprep.mubr.bf16.mxu0 %v822_v24  ;;  %v798_v0 = vmul.f32 %v1532_v41, %v2898_v22 }
 0x1dc   : > { %v1534_v25 = vpop.eup %1533  ;;  %v830_v35 = vpack.c.bf16 %v813_v44, %v812_v54 }
 0x1dd   : > { %v1536_v6 = vpop.eup %1535  ;;  %v799_v56 = vmul.f32 %v1534_v25, %v2899_v8 }
 0x1de   : > { %v1538_v9 = vpop.eup %1537  ;;  %1320 = vmatprep.mubr.bf16.mxu1 %v830_v35  ;;  %v814_v5 = vmul.f32 %v1536_v6, %v2900_v40  ;;  %v1550_v6 = vld [vmem:[%s1846_s29 + $0x38] sm:$0xff]  ;;  %v1552_v40 = vld [vmem:[%s1846_s29 + $0x28] sm:$0xff] }
 0x1df   : > { %v823_v31 = vpack.c.bf16 %v799_v56, %v798_v0  ;;  %v815_v17 = vmul.f32 %v1538_v9, %v2901_v58  ;;  %v1551_v0 = vld [vmem:[%s1846_s29 + $0xa0] sm:$0xff]  ;;  %v1553_v58 = vld [vmem:[%s1846_s29 + $0xb8] sm:$0xff] }
 0x1e1   : > { %1305 = vmatmul.mubr.bf16.gmra.mxu0 %v823_v31  ;;  %v831_v12 = vpack.c.bf16 %v815_v17, %v814_v5 }
 0x1e3   : > { %1321 = vmatmul.mubr.bf16.gmra.mxu1 %v831_v12 }
 0x274   : > { %v1294_v15 = vpop.f32.mrf.mxu0 }
 0x275   : > { %v946_v46 = vadd.f32 %v1294_v15, %v2655_v13 }
 0x276   : > { %v937_v52 = vpop.f32.mrf.mxu0 }
 0x277   : > { %v1066_v63 = vadd.f32 %v1539_v45, %v946_v46  ;;  %v938_v11 = vadd.f32 %v2655_v13, %v937_v52  ;;  %v1554_v52 = vld [vmem:[%s1846_s29 + $0xa8] sm:$0xff] }
 0x278   : > { %v1295_v39 = vpop.f32.mrf.mxu0 }
 0x279   : > { %1098 = vst [vmem:[%s2662_s17 + $0x10] sm:$0xff] %v1066_v63  ;;  %v1064_v59 = vadd.f32 %v1540_v10, %v938_v11  ;;  %v949_v61 = vadd.f32 %v1295_v39, %v2655_v13  ;;  %v1555_v63 = vld [vmem:[%s1846_s29 + $0x50] sm:$0xff] }
 0x27a   : > { %v940_v32 = vpop.f32.mrf.mxu0 }
 0x27b   : > { %1096 = vst [vmem:[%s2662_s17] sm:$0xff] %v1064_v59  ;;  %v1067_v2 = vadd.f32 %v1541_v19, %v949_v61  ;;  %v941_v27 = vadd.f32 %v2655_v13, %v940_v32  ;;  %v1556_v32 = vld [vmem:[%s1846_s29 + $0x40] sm:$0xff] }
 0x27d   : > { %1099 = vst [vmem:[%s2662_s17 + $0x18] sm:$0xff] %v1067_v2  ;;  %v1065_v7 = vadd.f32 %v1542_v57, %v941_v27 }
 0x27f   : > { %1097 = vst [vmem:[%s2662_s17 + $0x8] sm:$0xff] %v1065_v7 }
 0x280   : > { %v1310_v49 = vpop.f32.mrf.mxu1 }
 0x281   : > { %v1010_v60 = vadd.f32 %v1310_v49, %v2655_v13  ;;  %v1557_v49 = vld [vmem:[%s1846_s29 + $0xd0] sm:$0xff] }
 0x282   : > { %v1001_v53 = vpop.f32.mrf.mxu1 }
 0x283   : > { %v1082_v33 = vadd.f32 %v1543_v50, %v1010_v60  ;;  %v1002_v14 = vadd.f32 %v2655_v13, %v1001_v53  ;;  %v1558_v53 = vld [vmem:[%s1846_s29 + $0x58] sm:$0xff] }
 0x284   : > { %v1311_v42 = vpop.f32.mrf.mxu1 }
 0x285   : > { %1114 = vst [vmem:[%s2662_s17 + $0x90] sm:$0xff] %v1082_v33  ;;  %v1080_v38 = vadd.f32 %v1544_v1, %v1002_v14  ;;  %v1013_v23 = vadd.f32 %v1311_v42, %v2655_v13  ;;  %v1559_v42 = vld [vmem:[%s1846_s29 + $0xc0] sm:$0xff] }
 0x286   : > { %v1004_v26 = vpop.f32.mrf.mxu1 }
 0x287   : > { %1112 = vst [vmem:[%s2662_s17 + $0x80] sm:$0xff] %v1080_v38  ;;  %v1083_v55 = vadd.f32 %v1545_v30, %v1013_v23  ;;  %v1005_v36 = vadd.f32 %v2655_v13, %v1004_v26  ;;  %v1560_v23 = vld [vmem:[%s1846_s29 + $0x48] sm:$0xff] }
 0x289   : > { %1115 = vst [vmem:[%s2662_s17 + $0x98] sm:$0xff] %v1083_v55  ;;  %v1081_v21 = vadd.f32 %v1546_v16, %v1005_v36  ;;  %v1561_v55 = vld [vmem:[%s1846_s29 + $0xd8] sm:$0xff] }
 0x28b   : > { %1113 = vst [vmem:[%s2662_s17 + $0x88] sm:$0xff] %v1081_v21 }
 0x28c   : > { %v1298_v28 = vpop.f32.mrf.mxu0 }
 0x28d   : > { %v962_v48 = vadd.f32 %v1298_v28, %v2655_v13 }
 0x28e   : > { %v953_v3 = vpop.f32.mrf.mxu0 }
 0x28f   : > { %v1314_v29 = vpop.f32.mrf.mxu1  ;;  %v1070_v20 = vadd.f32 %v1547_v34, %v962_v48  ;;  %v954_v4 = vadd.f32 %v2655_v13, %v953_v3  ;;  %v1562_v48 = vld [vmem:[%s1846_s29 + $0xc8] sm:$0xff] }
 0x290   : > { %v1026_v37 = vadd.f32 %v1314_v29, %v2655_v13  ;;  %v1299_v18 = vpop.f32.mrf.mxu0 }
 0x291   : > { %v1017_v51 = vpop.f32.mrf.mxu1  ;;  %1102 = vst [vmem:[%s2662_s17 + $0x30] sm:$0xff] %v1070_v20  ;;  %v1068_v41 = vadd.f32 %v1548_v62, %v954_v4  ;;  %v965_v24 = vadd.f32 %v1299_v18, %v2655_v13  ;;  %v1563_v20 = vld [vmem:[%s1846_s29 + $0x70] sm:$0xff] }
 0x292   : > { %v1086_v54 = vadd.f32 %v1549_v43, %v1026_v37  ;;  %v1018_v47 = vadd.f32 %v2655_v13, %v1017_v51  ;;  %v956_v44 = vpop.f32.mrf.mxu0 }
 0x293   : > { %v1315_v25 = vpop.f32.mrf.mxu1  ;;  %1100 = vst [vmem:[%s2662_s17 + $0x20] sm:$0xff] %v1068_v41  ;;  %v1071_v35 = vadd.f32 %v1550_v6, %v965_v24  ;;  %v957_v22 = vadd.f32 %v2655_v13, %v956_v44  ;;  %v1564_v41 = vld [vmem:[%s1846_s29 + $0x60] sm:$0xff] }
 0x294   : > { %1118 = vst [vmem:[%s2662_s17 + $0xb0] sm:$0xff] %v1086_v54  ;;  %v1084_v8 = vadd.f32 %v1551_v0, %v1018_v47  ;;  %v1029_v56 = vadd.f32 %v1315_v25, %v2655_v13  ;;  %v1302_v31 = vpop.f32.mrf.mxu0  ;;  %v1565_v54 = vld [vmem:[%s1846_s29 + $0xf0] sm:$0xff] }
 0x295   : > { %v1020_v9 = vpop.f32.mrf.mxu1  ;;  %1103 = vst [vmem:[%s2662_s17 + $0x38] sm:$0xff] %v1071_v35  ;;  %v1069_v5 = vadd.f32 %v1552_v40, %v957_v22  ;;  %v978_v15 = vadd.f32 %v1302_v31, %v2655_v13  ;;  %v1566_v35 = vld [vmem:[%s1846_s29 + $0x78] sm:$0xff]  ;;  %v1568_v40 = vld [vmem:[%s1846_s29 + $0x68] sm:$0xff] }
 0x296   : > { %1116 = vst [vmem:[%s2662_s17 + $0xa0] sm:$0xff] %v1084_v8  ;;  %v1087_v17 = vadd.f32 %v1553_v58, %v1029_v56  ;;  %v1021_v12 = vadd.f32 %v2655_v13, %v1020_v9  ;;  %v969_v46 = vpop.f32.mrf.mxu0  ;;  %v1567_v8 = vld [vmem:[%s1846_s29 + $0xe0] sm:$0xff]  ;;  %v1569_v58 = vld [vmem:[%s1846_s29 + $0xf8] sm:$0xff] }
 0x297   : > { %1101 = vst [vmem:[%s2662_s17 + $0x28] sm:$0xff] %v1069_v5  ;;  %v1074_v11 = vadd.f32 %v1555_v63, %v978_v15  ;;  %v970_v39 = vadd.f32 %v2655_v13, %v969_v46  ;;  %v1318_v10 = vpop.f32.mrf.mxu1  ;;  %v1570_v15 = vld [vmem:[%s1846_s29 + $0xe8] sm:$0xff] }
 0x298   : > { %1119 = vst [vmem:[%s2662_s17 + $0xb8] sm:$0xff] %v1087_v17  ;;  %v1085_v45 = vadd.f32 %v1554_v52, %v1021_v12  ;;  %v1303_v59 = vpop.f32.mrf.mxu0  ;;  %v1042_v61 = vadd.f32 %v1318_v10, %v2655_v13 }
 0x299   : > { %1106 = vst [vmem:[%s2662_s17 + $0x50] sm:$0xff] %v1074_v11  ;;  %v1072_v19 = vadd.f32 %v1556_v32, %v970_v39  ;;  %v981_v2 = vadd.f32 %v1303_v59, %v2655_v13  ;;  %v1033_v27 = vpop.f32.mrf.mxu1 }
 0x29a   : > { %1117 = vst [vmem:[%s2662_s17 + $0xa8] sm:$0xff] %v1085_v45  ;;  %v1090_v60 = vadd.f32 %v1557_v49, %v1042_v61  ;;  %v972_v57 = vpop.f32.mrf.mxu0  ;;  %v1034_v7 = vadd.f32 %v2655_v13, %v1033_v27 }
 0x29b   : > { %1104 = vst [vmem:[%s2662_s17 + $0x40] sm:$0xff] %v1072_v19  ;;  %v1075_v50 = vadd.f32 %v1558_v53, %v981_v2  ;;  %v973_v33 = vadd.f32 %v2655_v13, %v972_v57  ;;  %v1319_v14 = vpop.f32.mrf.mxu1 }
 0x29c   : > { %1122 = vst [vmem:[%s2662_s17 + $0xd0] sm:$0xff] %v1090_v60  ;;  %v1088_v1 = vadd.f32 %v1559_v42, %v1034_v7  ;;  %v1045_v38 = vadd.f32 %v1319_v14, %v2655_v13 }
 0x29d   : > { %1107 = vst [vmem:[%s2662_s17 + $0x58] sm:$0xff] %v1075_v50  ;;  %v1073_v26 = vadd.f32 %v1560_v23, %v973_v33  ;;  %v1036_v30 = vpop.f32.mrf.mxu1 }
 0x29e   : > { %1120 = vst [vmem:[%s2662_s17 + $0xc0] sm:$0xff] %v1088_v1  ;;  %v1091_v36 = vadd.f32 %v1561_v55, %v1045_v38  ;;  %v1037_v16 = vadd.f32 %v2655_v13, %v1036_v30 }
 0x29f   : > { %1105 = vst [vmem:[%s2662_s17 + $0x48] sm:$0xff] %v1073_v26 }
 0x2a0   : > { %1123 = vst [vmem:[%s2662_s17 + $0xd8] sm:$0xff] %v1091_v36  ;;  %v1089_v3 = vadd.f32 %v1562_v48, %v1037_v16 }
 0x2a1   : > { %v1306_v21 = vpop.f32.mrf.mxu0 }
 0x2a2   : > { %v994_v28 = vadd.f32 %v1306_v21, %v2655_v13  ;;  %1121 = vst [vmem:[%s2662_s17 + $0xc8] sm:$0xff] %v1089_v3 }
 0x2a3   : > { %v985_v29 = vpop.f32.mrf.mxu0  ;;  %v1322_v34 = vpop.f32.mrf.mxu1 }
 0x2a4   : > { %v1078_v4 = vadd.f32 %v1563_v20, %v994_v28  ;;  %v986_v37 = vadd.f32 %v2655_v13, %v985_v29  ;;  %v1058_v18 = vadd.f32 %v1322_v34, %v2655_v13 }
 0x2a5   : > { %v1307_v51 = vpop.f32.mrf.mxu0  ;;  %v1049_v62 = vpop.f32.mrf.mxu1 }
 0x2a6   : > { %1110 = vst [vmem:[%s2662_s17 + $0x70] sm:$0xff] %v1078_v4  ;;  %v1076_v24 = vadd.f32 %v1564_v41, %v986_v37  ;;  %v997_v43 = vadd.f32 %v1307_v51, %v2655_v13  ;;  %v1094_v47 = vadd.f32 %v1565_v54, %v1058_v18  ;;  %v1050_v44 = vadd.f32 %v2655_v13, %v1049_v62 }
 0x2a7   : > { %v988_v25 = vpop.f32.mrf.mxu0  ;;  %v1323_v6 = vpop.f32.mrf.mxu1 }
 0x2a8   : > { %1108 = vst [vmem:[%s2662_s17 + $0x60] sm:$0xff] %v1076_v24  ;;  %v1079_v22 = vadd.f32 %v1566_v35, %v997_v43  ;;  %1126 = vst [vmem:[%s2662_s17 + $0xf0] sm:$0xff] %v1094_v47  ;;  %v989_v0 = vadd.f32 %v2655_v13, %v988_v25  ;;  %v1092_v56 = vadd.f32 %v1567_v8, %v1050_v44 }
 0x2a9   : > { %v1061_v9 = vadd.f32 %v1323_v6, %v2655_v13  ;;  %v1052_v31 = vpop.f32.mrf.mxu1 }
 0x2aa   : > { %1111 = vst [vmem:[%s2662_s17 + $0x78] sm:$0xff] %v1079_v22  ;;  %v1077_v5 = vadd.f32 %v1568_v40, %v989_v0  ;;  %1124 = vst [vmem:[%s2662_s17 + $0xe0] sm:$0xff] %v1092_v56  ;;  %v1053_v12 = vadd.f32 %v2655_v13, %v1052_v31 }
 0x2ab   : > { %v1095_v17 = vadd.f32 %v1569_v58, %v1061_v9 }
 0x2ac   : > { %1109 = vst [vmem:[%s2662_s17 + $0x68] sm:$0xff] %v1077_v5  ;;  %v1093_v46 = vadd.f32 %v1570_v15, %v1053_v12 }
 0x2ad   : > { %1127 = vst [vmem:[%s2662_s17 + $0xf8] sm:$0xff] %v1095_v17 }
 0x2ae   : > { %1125 = vst [vmem:[%s2662_s17 + $0xe8] sm:$0xff] %v1093_v46 }
 0x2af   : > { %1638 = shalt.err (!%p1635_p0)
}
 0x2b0   : > { %s1639_s11 = scalar_lea.hbm %s2758_s4, 4096  ;;  %s1643_s28 = scalar_lea.hbm %s2810_s3, 8192 }
 0x2b1   : > { %p1640_p5 = scmp.ne.s32.totalorder %s2758_s4, %s1639_s11  ;;  %p1644_p4 = scmp.lt.s32.totalorder %s2758_s4, %s2810_s3 }
 0x2b2   : > { %p1645_p6 = scmp.lt.s32.totalorder %s1643_s28, %s1639_s11 }
 0x2b3   : > { %p1641_p9 = pnand %p1640_p5, %p2902_p11 }
 0x2b4   : > { %p1646_p8 = por %p1645_p6, %p1644_p4 }
 0x2b5   : > { %p1642_p1 = pneg %p1641_p9 }
 0x2b7   : > { %p1647_p3 = pnand %p1646_p8, %p1642_p1 }
 0x2b9   : > { %1650 = shalt.err (!%p1647_p3)
}
 0x2ba   : > { %s1702_s20 = smov 128   ;;  %s1703_s17 = smov 8  }
 0x2bb   : > { %1346 = dma.vmem_to_hbm [thread:$0]  (%p2902_p11), %s2760_s23, 4096, %s2758_s4, %s1129_s16, %s1702_s20, %s1702_s20, %s1703_s17  }
 0x2bc PF: > { %s1157_s22 = sand.u32 1, %s1681_s12   ;;  %p2903_p7 = scmp.ne.s32.totalorder %s2833_s19, 0 }
 0x2bd   : > { %p2904_p12 = scmp.ge.s32.totalorder %s1693_s15, 2  ;;  %s1158_s25 = scalar_lea.sflag [#allocation4], %s1157_s22 }
 0x2bf   : > { %p1357_p10 = pnand %p2904_p12, %p2903_p7 }
 0x2c1   : > { %p1358_p2 = pneg %p1357_p10 }
 0x2c3   : > { %1676 = dma.done.wait (%p1358_p2), %s1158_s25, 4096  }
 0x2c4   : > { %1678 = vsyncadd (%p1358_p2), %s1158_s25, 4294963200  ;;  %p17_p13 = scmp.ge.s32.totalorder %s1778_s24, 4   ;;  %s2905_s12 = smov %s1685_s13 }
 0x2c5   : > { %s2906_s13 = smov %s1689_s14  ;;  %s2907_s14 = smov %s1795_s5 }
 0x2c6   : > { %s2908_s15 = smov %s1778_s24  ;;  %19 = sbr.rel (!%p17_p13) target bundleno = 6 (0x6), region = 81 }
 0x2cb   :  { %1163 = vsyncpa [#allocation3], 1 }
 0x2cc   :  { %1165 = vsyncpa [#allocation3 + $0x1], 1 }
 0x2cd   :  { %1166 = vsyncpa [#allocation6], 1 }
 0x2ce   :  { %1167 = vsyncpa [#allocation4], 1 }
 0x2cf   :  { %1169 = vsyncpa [#allocation4 + $0x1], 1 }

</bundles_post_ra>
